<compile_context>
chip_gen: v7x
topology: tpu7x:2x2x1
jax: 0.10.0
libtpu: 0.0.40
codegen_flags: <defaults>
</compile_context>

<pallas_src>
import functools

import jax
import jax.numpy as jnp
from jax.experimental import pallas as pl
from jax.experimental.pallas import tpu as pltpu

LN_EPS = 1e-5
SHIFTS = ((1, -1, 0, 0), (-1, 1, 0, 0), (0, 0, 1, -1), (0, 0, -1, 1))


def _round_up(x, m):
    return (x + m - 1) // m * m


def _cdiv(a, b):
    return -(-a // b)


def torch_style_pad(x, pad):
    # Reproduce F.pad(x, (wl, wr, ht, hb)) on NCHW; negative values crop.
    wl, wr, ht, hb = pad
    x = jnp.pad(
        x, ((0, 0), (0, 0), (max(ht, 0), max(hb, 0)), (max(wl, 0), max(wr, 0))))
    h0, h1 = max(-ht, 0), x.shape[2] - max(-hb, 0)
    w0, w1 = max(-wl, 0), x.shape[3] - max(-wr, 0)
    return x[:, :, h0:h1, w0:w1]


def _patchify(v, p):
    # 'b c (h p1) (w p2) -> (b h w) (p1 p2 c)' for one channel group.
    B, C, H, W = v.shape
    h, w = H // p, W // p
    vr = v.reshape(B, C, h, p, w, p).transpose(0, 2, 4, 3, 5, 1)
    return vr.reshape(B * h * w, p * p * C)


def _regroup_k(a, p, c):
    # Reorder weight rows from the torch K-order (p1, p2, group, c) to the
    # kernel K-order (group, p1, p2, c) implied by the per-shift chunk inputs.
    tail = a.shape[1:]
    a = a.reshape(p, p, 5, c, *tail)
    a = jnp.moveaxis(a, 2, 0)
    return a.reshape(5 * p * p * c, *tail)


def spt_kernel(c0_ref, c1_ref, c2_ref, c3_ref, c4_ref, w_ref, b_ref, o_ref,
               *, chunk_k, inv_k):
    # c*_ref: (tile_m, chunk_k) bf16 token chunks, one per shift group.
    # w_ref:  (5*chunk_k, dim) bf16 projection with gamma folded in.
    # b_ref:  (1, dim) f32 bias with beta folded in.
    # o_ref:  (tile_m, dim).
    xs = [r[...].astype(jnp.float32)
          for r in (c0_ref, c1_ref, c2_ref, c3_ref, c4_ref)]

    # LayerNorm statistics over the full patch_dim (two-pass, centered
    # variance -> no E[x^2]-E[x]^2 cancellation).
    s1 = xs[0].sum(axis=-1, keepdims=True)
    for xv in xs[1:]:
        s1 = s1 + xv.sum(axis=-1, keepdims=True)
    mean = s1 * inv_k
    s2 = jnp.zeros_like(mean)
    for xv in xs:
        xc = xv - mean
        s2 = s2 + jnp.sum(xc * xc, axis=-1, keepdims=True)
    rstd = jax.lax.rsqrt(s2 * inv_k + LN_EPS)

    # Projection: per-chunk bf16 matmuls against the matching weight rows,
    # f32 accumulation on the MXU.
    acc = jnp.zeros(o_ref.shape, jnp.float32)
    for g, xv in enumerate(xs):
        xn = ((xv - mean) * rstd).astype(jnp.bfloat16)
        w_g = w_ref[g * chunk_k:(g + 1) * chunk_k, :]
        acc = acc + jnp.dot(xn, w_g, preferred_element_type=jnp.float32)
    o_ref[...] = (acc + b_ref[...]).astype(o_ref.dtype)


def spt_forward(x, params, patch_size, *, tile_m_cap=512,
                out_dtype=jnp.float32, staging_dtype=jnp.bfloat16):
    """x: [B, C, H, W] float -> [B, (H/p)*(W/p), dim]."""
    gamma, beta, wmat, bias = params
    B, C, H, W = x.shape
    p = patch_size
    h, w = H // p, W // p
    M = B * h * w
    chunk_k = p * p * C
    K = 5 * chunk_k
    dim = wmat.shape[-1]

    # --- Staging: five shifted views -> five (M, chunk_k) token chunks.  Each
    # chunk is one pad + transpose (XLA fuses the pad/slice into the copy); no
    # 5x-channel concat and no zero-padded token matrix is ever written.
    xs = x.astype(staging_dtype)
    views = [xs] + [torch_style_pad(xs, s) for s in SHIFTS]
    chunks = [_patchify(v, p) for v in views]
    # TODO(synk): gather the patch rows straight from the image inside the
    # kernel (pl.ANY HBM ref + manual DMA) to also remove the per-view
    # patchify transpose; the in-VMEM (R, w, k)->(R*w, k) relayout it needs
    # is not yet robust in Mosaic, so it stays in plain JAX.

    # --- Fold the LayerNorm affine into the projection (removes per-tile
    # gamma/beta VALU work and two operand pipelines).
    gamma = gamma.reshape(-1).astype(jnp.float32)
    beta = beta.reshape(-1).astype(jnp.float32)
    wmat = wmat.astype(jnp.float32)
    bias = bias.reshape(1, -1).astype(jnp.float32)
    w_fold = gamma[:, None] * wmat                       # [K, dim]
    b_fold = bias + beta[None, :] @ wmat                 # [1, dim]
    w_kern = _regroup_k(w_fold, p, C).astype(jnp.bfloat16)

    # --- Generation-aware, balanced row tiling; guarantee >= 2 grid steps so
    # v7x's two TensorCores both get work under dimension_semantics=parallel.
    try:
        vmem_cap = int(pltpu.get_tpu_info().vmem_capacity_bytes)
    except Exception:
        vmem_cap = 64 << 20                              # v7x-safe default
    tok_b = jnp.dtype(staging_dtype).itemsize
    out_b = jnp.dtype(out_dtype).itemsize
    const_bytes = K * dim * 2 + dim * 4                  # weight (bf16) + bias
    per_row = 2 * (K * tok_b + dim * out_b) + K * 4      # streams + f32 temps
    cap_rows = max((int(vmem_cap * 0.55) - 2 * const_bytes) // per_row, 64)
    tile_m_max = max(min(tile_m_cap, cap_rows // 8 * 8), 8)
    n_tiles = _cdiv(M, tile_m_max)
    if M >= 16:
        n_tiles = max(n_tiles, 2)
    tile_m = min(_round_up(_cdiv(M, n_tiles), 8), _round_up(M, 8))
    grid = (_cdiv(M, tile_m),)

    vmem_bytes = int(2 * const_bytes
                     + 2 * tile_m * (K * tok_b + dim * out_b)
                     + tile_m * K * 4                    # in-kernel f32 temps
                     + (8 << 20))                        # headroom
    vmem_bytes = min(vmem_bytes, vmem_cap - (2 << 20))

    cost = pl.CostEstimate(
        flops=int(2 * M * K * dim + 8 * M * K),
        transcendentals=int(M),
        bytes_accessed=int(M * K * tok_b + K * dim * 2 + M * dim * out_b),
    )

    kernel = functools.partial(spt_kernel, chunk_k=chunk_k, inv_k=1.0 / K)

    def run(single_buffer_consts):
        const_kw = (dict(pipeline_mode=pl.Buffered(1))
                    if single_buffer_consts else {})
        in_specs = (
            [pl.BlockSpec((tile_m, chunk_k), lambda i: (i, 0))] * 5
            + [pl.BlockSpec((K, dim), lambda i: (0, 0), **const_kw),
               pl.BlockSpec((1, dim), lambda i: (0, 0), **const_kw)])
        return pl.pallas_call(
            kernel,
            out_shape=jax.ShapeDtypeStruct((M, dim), out_dtype),
            grid=grid,
            in_specs=in_specs,
            out_specs=pl.BlockSpec((tile_m, dim), lambda i: (i, 0)),
            compiler_params=pltpu.CompilerParams(
                dimension_semantics=("parallel",),
                vmem_limit_bytes=vmem_bytes),
            cost_estimate=cost,
        )(*chunks, w_kern, b_fold)

    try:
        # Single-buffer the grid-invariant operands (constant index maps).
        out = run(True)
    except Exception:
        # Fallback for jax versions without single-buffer pipeline_mode.
        out = run(False)

    return out.reshape(B, h * w, dim)


def spt_reference(x, params, patch_size):
    # Pure-JAX f32 reference (exact torch semantics / K ordering).
    gamma, beta, wmat, bias = params
    B, C, H, W = x.shape
    p = patch_size
    shifted = [torch_style_pad(x, s) for s in SHIFTS]
    x5 = jnp.concatenate([x, *shifted], axis=1)
    C5 = 5 * C
    h, w = H // p, W // p
    xr = x5.reshape(B, C5, h, p, w, p).transpose(0, 2, 4, 3, 5, 1)
    tokens = xr.reshape(B, h * w, p * p * C5)
    mean = jnp.mean(tokens, axis=-1, keepdims=True)
    var = jnp.mean((tokens - mean) ** 2, axis=-1, keepdims=True)
    xn = (tokens - mean) * jax.lax.rsqrt(var + LN_EPS)
    xn = xn * gamma.reshape(-1) + beta.reshape(-1)
    return jnp.einsum("bnk,kd->bnd", xn, wmat) + bias.reshape(-1)


if __name__ == "__main__":
    B, C, H, W = 2, 3, 16, 16
    patch_size = 4
    dim = 32
    patch_dim = patch_size * patch_size * 5 * C          # 240

    key = jax.random.PRNGKey(0)
    kx, kw, kg, kb, kc = jax.random.split(key, 5)
    x = jax.random.normal(kx, (B, C, H, W), dtype=jnp.float32)

    # Non-trivial LN affine so the gamma/beta folding is actually exercised.
    gamma = 1.0 + 0.1 * jax.random.normal(kg, (patch_dim,), dtype=jnp.float32)
    beta = 0.05 * jax.random.normal(kb, (patch_dim,), dtype=jnp.float32)
    wmat = 0.02 * jax.random.normal(kw, (patch_dim, dim), dtype=jnp.float32)
    bias = 0.01 * jax.random.normal(kc, (dim,), dtype=jnp.float32)
    params = (gamma, beta, wmat, bias)

    out = spt_forward(x, params, patch_size)
    out = jax.block_until_ready(out)

    ref = spt_reference(x, params, patch_size)
    assert out.shape == (B, (H // patch_size) * (W // patch_size), dim), out.shape
    # bf16 staging + bf16 MXU operands (f32 accumulation) -> loose tolerance.
    assert jnp.allclose(out, ref, atol=2e-2, rtol=2e-2), "mismatch vs reference"

    print("KERNEL_OK")
</pallas_src>

<mosaic_0001>
module attributes {stable_mosaic.version = 11 : i64} {
  func.func @spt_kernel(%arg0: i32, %arg1: memref<16x48xbf16, #tpu.memory_space<vmem>>, %arg2: memref<16x48xbf16, #tpu.memory_space<vmem>>, %arg3: memref<16x48xbf16, #tpu.memory_space<vmem>>, %arg4: memref<16x48xbf16, #tpu.memory_space<vmem>>, %arg5: memref<16x48xbf16, #tpu.memory_space<vmem>>, %arg6: memref<240x32xbf16, #tpu.memory_space<vmem>>, %arg7: memref<1x32xf32, #tpu.memory_space<vmem>>, %arg8: memref<16x32xf32, #tpu.memory_space<vmem>>) attributes {dimension_semantics = [#tpu.dimension_semantics<parallel>], iteration_bounds = array<i64: 2>, scalar_prefetch = 0 : i64, scratch_operands = 0 : i64, tpu.core_type = #tpu.core_type<tc>, window_params = [{transform_indices = @transform_0, window_bounds = array<i64: 16, 48>}, {transform_indices = @transform_1, window_bounds = array<i64: 16, 48>}, {transform_indices = @transform_2, window_bounds = array<i64: 16, 48>}, {transform_indices = @transform_3, window_bounds = array<i64: 16, 48>}, {transform_indices = @transform_4, window_bounds = array<i64: 16, 48>}, {pipeline_mode = #tpu.pipeline_mode<synchronous>, transform_indices = @transform_5, window_bounds = array<i64: 240, 32>}, {pipeline_mode = #tpu.pipeline_mode<synchronous>, transform_indices = @transform_6, window_bounds = array<i64: 1, 32>}, {transform_indices = @transform_7, window_bounds = array<i64: 16, 32>}]} {
    %c0 = arith.constant 0 : index
    %c0_0 = arith.constant 0 : index
    %0 = vector.load %arg1[%c0, %c0_0] : memref<16x48xbf16, #tpu.memory_space<vmem>>, vector<16x48xbf16>
    %1 = arith.extf %0 : vector<16x48xbf16> to vector<16x48xf32>
    %c0_1 = arith.constant 0 : index
    %c0_2 = arith.constant 0 : index
    %2 = vector.load %arg2[%c0_1, %c0_2] : memref<16x48xbf16, #tpu.memory_space<vmem>>, vector<16x48xbf16>
    %3 = arith.extf %2 : vector<16x48xbf16> to vector<16x48xf32>
    %c0_3 = arith.constant 0 : index
    %c0_4 = arith.constant 0 : index
    %4 = vector.load %arg3[%c0_3, %c0_4] : memref<16x48xbf16, #tpu.memory_space<vmem>>, vector<16x48xbf16>
    %5 = arith.extf %4 : vector<16x48xbf16> to vector<16x48xf32>
    %c0_5 = arith.constant 0 : index
    %c0_6 = arith.constant 0 : index
    %6 = vector.load %arg4[%c0_5, %c0_6] : memref<16x48xbf16, #tpu.memory_space<vmem>>, vector<16x48xbf16>
    %7 = arith.extf %6 : vector<16x48xbf16> to vector<16x48xf32>
    %c0_7 = arith.constant 0 : index
    %c0_8 = arith.constant 0 : index
    %8 = vector.load %arg5[%c0_7, %c0_8] : memref<16x48xbf16, #tpu.memory_space<vmem>>, vector<16x48xbf16>
    %9 = arith.extf %8 : vector<16x48xbf16> to vector<16x48xf32>
    %cst = arith.constant dense<0.000000e+00> : vector<16xf32>
    %10 = vector.multi_reduction <add>, %1, %cst [1] : vector<16x48xf32> to vector<16xf32>
    %11 = vector.shape_cast %10 : vector<16xf32> to vector<16x1xf32>
    %cst_9 = arith.constant dense<0.000000e+00> : vector<16xf32>
    %12 = vector.multi_reduction <add>, %3, %cst_9 [1] : vector<16x48xf32> to vector<16xf32>
    %13 = vector.shape_cast %12 : vector<16xf32> to vector<16x1xf32>
    %14 = arith.addf %11, %13 : vector<16x1xf32>
    %cst_10 = arith.constant dense<0.000000e+00> : vector<16xf32>
    %15 = vector.multi_reduction <add>, %5, %cst_10 [1] : vector<16x48xf32> to vector<16xf32>
    %16 = vector.shape_cast %15 : vector<16xf32> to vector<16x1xf32>
    %17 = arith.addf %14, %16 : vector<16x1xf32>
    %cst_11 = arith.constant dense<0.000000e+00> : vector<16xf32>
    %18 = vector.multi_reduction <add>, %7, %cst_11 [1] : vector<16x48xf32> to vector<16xf32>
    %19 = vector.shape_cast %18 : vector<16xf32> to vector<16x1xf32>
    %20 = arith.addf %17, %19 : vector<16x1xf32>
    %cst_12 = arith.constant dense<0.000000e+00> : vector<16xf32>
    %21 = vector.multi_reduction <add>, %9, %cst_12 [1] : vector<16x48xf32> to vector<16xf32>
    %22 = vector.shape_cast %21 : vector<16xf32> to vector<16x1xf32>
    %23 = arith.addf %20, %22 : vector<16x1xf32>
    %cst_13 = arith.constant 0.00416666688 : f32
    %24 = vector.broadcast %cst_13 : f32 to vector<16x1xf32>
    %25 = arith.mulf %23, %24 : vector<16x1xf32>
    %cst_14 = arith.constant 0.000000e+00 : f32
    %26 = vector.broadcast %cst_14 : f32 to vector<16x1xf32>
    %27 = vector.broadcast %25 : vector<16x1xf32> to vector<16x48xf32>
    %28 = arith.subf %1, %27 : vector<16x48xf32>
    %29 = arith.mulf %28, %28 : vector<16x48xf32>
    %cst_15 = arith.constant dense<0.000000e+00> : vector<16xf32>
    %30 = vector.multi_reduction <add>, %29, %cst_15 [1] : vector<16x48xf32> to vector<16xf32>
    %31 = vector.shape_cast %30 : vector<16xf32> to vector<16x1xf32>
    %32 = arith.addf %26, %31 : vector<16x1xf32>
    %33 = vector.broadcast %25 : vector<16x1xf32> to vector<16x48xf32>
    %34 = arith.subf %3, %33 : vector<16x48xf32>
    %35 = arith.mulf %34, %34 : vector<16x48xf32>
    %cst_16 = arith.constant dense<0.000000e+00> : vector<16xf32>
    %36 = vector.multi_reduction <add>, %35, %cst_16 [1] : vector<16x48xf32> to vector<16xf32>
    %37 = vector.shape_cast %36 : vector<16xf32> to vector<16x1xf32>
    %38 = arith.addf %32, %37 : vector<16x1xf32>
    %39 = vector.broadcast %25 : vector<16x1xf32> to vector<16x48xf32>
    %40 = arith.subf %5, %39 : vector<16x48xf32>
    %41 = arith.mulf %40, %40 : vector<16x48xf32>
    %cst_17 = arith.constant dense<0.000000e+00> : vector<16xf32>
    %42 = vector.multi_reduction <add>, %41, %cst_17 [1] : vector<16x48xf32> to vector<16xf32>
    %43 = vector.shape_cast %42 : vector<16xf32> to vector<16x1xf32>
    %44 = arith.addf %38, %43 : vector<16x1xf32>
    %45 = vector.broadcast %25 : vector<16x1xf32> to vector<16x48xf32>
    %46 = arith.subf %7, %45 : vector<16x48xf32>
    %47 = arith.mulf %46, %46 : vector<16x48xf32>
    %cst_18 = arith.constant dense<0.000000e+00> : vector<16xf32>
    %48 = vector.multi_reduction <add>, %47, %cst_18 [1] : vector<16x48xf32> to vector<16xf32>
    %49 = vector.shape_cast %48 : vector<16xf32> to vector<16x1xf32>
    %50 = arith.addf %44, %49 : vector<16x1xf32>
    %51 = vector.broadcast %25 : vector<16x1xf32> to vector<16x48xf32>
    %52 = arith.subf %9, %51 : vector<16x48xf32>
    %53 = arith.mulf %52, %52 : vector<16x48xf32>
    %cst_19 = arith.constant dense<0.000000e+00> : vector<16xf32>
    %54 = vector.multi_reduction <add>, %53, %cst_19 [1] : vector<16x48xf32> to vector<16xf32>
    %55 = vector.shape_cast %54 : vector<16xf32> to vector<16x1xf32>
    %56 = arith.addf %50, %55 : vector<16x1xf32>
    %cst_20 = arith.constant 0.00416666688 : f32
    %57 = vector.broadcast %cst_20 : f32 to vector<16x1xf32>
    %58 = arith.mulf %56, %57 : vector<16x1xf32>
    %cst_21 = arith.constant 9.99999974E-6 : f32
    %59 = vector.broadcast %cst_21 : f32 to vector<16x1xf32>
    %60 = arith.addf %58, %59 : vector<16x1xf32>
    %61 = math.rsqrt %60 : vector<16x1xf32>
    %cst_22 = arith.constant 0.000000e+00 : f32
    %62 = vector.broadcast %cst_22 : f32 to vector<16x32xf32>
    %63 = vector.broadcast %25 : vector<16x1xf32> to vector<16x48xf32>
    %64 = arith.subf %1, %63 : vector<16x48xf32>
    %65 = vector.broadcast %61 : vector<16x1xf32> to vector<16x48xf32>
    %66 = arith.mulf %64, %65 : vector<16x48xf32>
    %67 = arith.truncf %66 : vector<16x48xf32> to vector<16x48xbf16>
    %c0_23 = arith.constant 0 : index
    %c0_24 = arith.constant 0 : index
    %68 = vector.load %arg6[%c0_23, %c0_24] : memref<240x32xbf16, #tpu.memory_space<vmem>>, vector<48x32xbf16>
    %cst_25 = arith.constant dense<0.000000e+00> : vector<16x32xf32>
    %69 = tpu.matmul %67, %68, %cst_25 {dimension_numbers = #tpu.dot_dimension_numbers<[1], [0], [0], [1], [0, 0, 1, 1], [], []>} : vector<16x48xbf16>, vector<48x32xbf16>, vector<16x32xf32> -> vector<16x32xf32>
    %70 = arith.addf %62, %69 : vector<16x32xf32>
    %71 = vector.broadcast %25 : vector<16x1xf32> to vector<16x48xf32>
    %72 = arith.subf %3, %71 : vector<16x48xf32>
    %73 = vector.broadcast %61 : vector<16x1xf32> to vector<16x48xf32>
    %74 = arith.mulf %72, %73 : vector<16x48xf32>
    %75 = arith.truncf %74 : vector<16x48xf32> to vector<16x48xbf16>
    %c48 = arith.constant 48 : index
    %c0_26 = arith.constant 0 : index
    %76 = vector.load %arg6[%c48, %c0_26] : memref<240x32xbf16, #tpu.memory_space<vmem>>, vector<48x32xbf16>
    %cst_27 = arith.constant dense<0.000000e+00> : vector<16x32xf32>
    %77 = tpu.matmul %75, %76, %cst_27 {dimension_numbers = #tpu.dot_dimension_numbers<[1], [0], [0], [1], [0, 0, 1, 1], [], []>} : vector<16x48xbf16>, vector<48x32xbf16>, vector<16x32xf32> -> vector<16x32xf32>
    %78 = arith.addf %70, %77 : vector<16x32xf32>
    %79 = vector.broadcast %25 : vector<16x1xf32> to vector<16x48xf32>
    %80 = arith.subf %5, %79 : vector<16x48xf32>
    %81 = vector.broadcast %61 : vector<16x1xf32> to vector<16x48xf32>
    %82 = arith.mulf %80, %81 : vector<16x48xf32>
    %83 = arith.truncf %82 : vector<16x48xf32> to vector<16x48xbf16>
    %c96 = arith.constant 96 : index
    %c0_28 = arith.constant 0 : index
    %84 = vector.load %arg6[%c96, %c0_28] : memref<240x32xbf16, #tpu.memory_space<vmem>>, vector<48x32xbf16>
    %cst_29 = arith.constant dense<0.000000e+00> : vector<16x32xf32>
    %85 = tpu.matmul %83, %84, %cst_29 {dimension_numbers = #tpu.dot_dimension_numbers<[1], [0], [0], [1], [0, 0, 1, 1], [], []>} : vector<16x48xbf16>, vector<48x32xbf16>, vector<16x32xf32> -> vector<16x32xf32>
    %86 = arith.addf %78, %85 : vector<16x32xf32>
    %87 = vector.broadcast %25 : vector<16x1xf32> to vector<16x48xf32>
    %88 = arith.subf %7, %87 : vector<16x48xf32>
    %89 = vector.broadcast %61 : vector<16x1xf32> to vector<16x48xf32>
    %90 = arith.mulf %88, %89 : vector<16x48xf32>
    %91 = arith.truncf %90 : vector<16x48xf32> to vector<16x48xbf16>
    %c144 = arith.constant 144 : index
    %c0_30 = arith.constant 0 : index
    %92 = vector.load %arg6[%c144, %c0_30] : memref<240x32xbf16, #tpu.memory_space<vmem>>, vector<48x32xbf16>
    %cst_31 = arith.constant dense<0.000000e+00> : vector<16x32xf32>
    %93 = tpu.matmul %91, %92, %cst_31 {dimension_numbers = #tpu.dot_dimension_numbers<[1], [0], [0], [1], [0, 0, 1, 1], [], []>} : vector<16x48xbf16>, vector<48x32xbf16>, vector<16x32xf32> -> vector<16x32xf32>
    %94 = arith.addf %86, %93 : vector<16x32xf32>
    %95 = vector.broadcast %25 : vector<16x1xf32> to vector<16x48xf32>
    %96 = arith.subf %9, %95 : vector<16x48xf32>
    %97 = vector.broadcast %61 : vector<16x1xf32> to vector<16x48xf32>
    %98 = arith.mulf %96, %97 : vector<16x48xf32>
    %99 = arith.truncf %98 : vector<16x48xf32> to vector<16x48xbf16>
    %c192 = arith.constant 192 : index
    %c0_32 = arith.constant 0 : index
    %100 = vector.load %arg6[%c192, %c0_32] : memref<240x32xbf16, #tpu.memory_space<vmem>>, vector<48x32xbf16>
    %cst_33 = arith.constant dense<0.000000e+00> : vector<16x32xf32>
    %101 = tpu.matmul %99, %100, %cst_33 {dimension_numbers = #tpu.dot_dimension_numbers<[1], [0], [0], [1], [0, 0, 1, 1], [], []>} : vector<16x48xbf16>, vector<48x32xbf16>, vector<16x32xf32> -> vector<16x32xf32>
    %102 = arith.addf %94, %101 : vector<16x32xf32>
    %c0_34 = arith.constant 0 : index
    %c0_35 = arith.constant 0 : index
    %103 = vector.load %arg7[%c0_34, %c0_35] : memref<1x32xf32, #tpu.memory_space<vmem>>, vector<1x32xf32>
    %104 = vector.broadcast %103 : vector<1x32xf32> to vector<16x32xf32>
    %105 = arith.addf %102, %104 : vector<16x32xf32>
    %c0_36 = arith.constant 0 : index
    %c0_37 = arith.constant 0 : index
    %106 = vector.load %arg8[%c0_36, %c0_37] : memref<16x32xf32, #tpu.memory_space<vmem>>, vector<16x32xf32>
    tpu.vector_store %arg8[%c0_36, %c0_37], %105 {strides = array<i32>} : memref<16x32xf32, #tpu.memory_space<vmem>>, vector<16x32xf32>,
    return
  }
  func.func @transform_0(%arg0: i32) -> (i32, i32) {
    %c0_i32 = arith.constant 0 : i32
    %c0_i32_0 = arith.constant 0 : i32
    return %arg0, %c0_i32 : i32, i32
  }
  func.func @transform_1(%arg0: i32) -> (i32, i32) {
    %c0_i32 = arith.constant 0 : i32
    %c0_i32_0 = arith.constant 0 : i32
    return %arg0, %c0_i32 : i32, i32
  }
  func.func @transform_2(%arg0: i32) -> (i32, i32) {
    %c0_i32 = arith.constant 0 : i32
    %c0_i32_0 = arith.constant 0 : i32
    return %arg0, %c0_i32 : i32, i32
  }
  func.func @transform_3(%arg0: i32) -> (i32, i32) {
    %c0_i32 = arith.constant 0 : i32
    %c0_i32_0 = arith.constant 0 : i32
    return %arg0, %c0_i32 : i32, i32
  }
  func.func @transform_4(%arg0: i32) -> (i32, i32) {
    %c0_i32 = arith.constant 0 : i32
    %c0_i32_0 = arith.constant 0 : i32
    return %arg0, %c0_i32 : i32, i32
  }
  func.func @transform_5(%arg0: i32) -> (i32, i32) {
    %c0_i32 = arith.constant 0 : i32
    %c0_i32_0 = arith.constant 0 : i32
    %c0_i32_1 = arith.constant 0 : i32
    return %c0_i32, %c0_i32_0 : i32, i32
  }
  func.func @transform_6(%arg0: i32) -> (i32, i32) {
    %c0_i32 = arith.constant 0 : i32
    %c0_i32_0 = arith.constant 0 : i32
    %c0_i32_1 = arith.constant 0 : i32
    return %c0_i32, %c0_i32_0 : i32, i32
  }
  func.func @transform_7(%arg0: i32) -> (i32, i32) {
    %c0_i32 = arith.constant 0 : i32
    %c0_i32_0 = arith.constant 0 : i32
    return %arg0, %c0_i32 : i32, i32
  }
}

module attributes {stable_mosaic.version = 11 : i64} {
  func.func @spt_kernel(%arg0: i32, %arg1: memref<16x48xbf16, #tpu.memory_space<vmem>>, %arg2: memref<16x48xbf16, #tpu.memory_space<vmem>>, %arg3: memref<16x48xbf16, #tpu.memory_space<vmem>>, %arg4: memref<16x48xbf16, #tpu.memory_space<vmem>>, %arg5: memref<16x48xbf16, #tpu.memory_space<vmem>>, %arg6: memref<240x32xbf16, #tpu.memory_space<vmem>>, %arg7: memref<1x32xf32, #tpu.memory_space<vmem>>, %arg8: memref<16x32xf32, #tpu.memory_space<vmem>>) attributes {dimension_semantics = [#tpu.dimension_semantics<parallel>], iteration_bounds = array<i64: 2>, scalar_prefetch = 0 : i64, scratch_operands = 0 : i64, tpu.core_type = #tpu.core_type<tc>, window_params = [{transform_indices = @transform_0, window_bounds = array<i64: 16, 48>}, {transform_indices = @transform_1, window_bounds = array<i64: 16, 48>}, {transform_indices = @transform_2, window_bounds = array<i64: 16, 48>}, {transform_indices = @transform_3, window_bounds = array<i64: 16, 48>}, {transform_indices = @transform_4, window_bounds = array<i64: 16, 48>}, {pipeline_mode = #tpu.pipeline_mode<synchronous>, transform_indices = @transform_5, window_bounds = array<i64: 240, 32>}, {pipeline_mode = #tpu.pipeline_mode<synchronous>, transform_indices = @transform_6, window_bounds = array<i64: 1, 32>}, {transform_indices = @transform_7, window_bounds = array<i64: 16, 32>}]} {
    %c0 = arith.constant 0 : index
    %c0_0 = arith.constant 0 : index
    %0 = vector.load %arg1[%c0, %c0_0] : memref<16x48xbf16, #tpu.memory_space<vmem>>, vector<16x48xbf16>
    %1 = arith.extf %0 : vector<16x48xbf16> to vector<16x48xf32>
    %c0_1 = arith.constant 0 : index
    %c0_2 = arith.constant 0 : index
    %2 = vector.load %arg2[%c0_1, %c0_2] : memref<16x48xbf16, #tpu.memory_space<vmem>>, vector<16x48xbf16>
    %3 = arith.extf %2 : vector<16x48xbf16> to vector<16x48xf32>
    %c0_3 = arith.constant 0 : index
    %c0_4 = arith.constant 0 : index
    %4 = vector.load %arg3[%c0_3, %c0_4] : memref<16x48xbf16, #tpu.memory_space<vmem>>, vector<16x48xbf16>
    %5 = arith.extf %4 : vector<16x48xbf16> to vector<16x48xf32>
    %c0_5 = arith.constant 0 : index
    %c0_6 = arith.constant 0 : index
    %6 = vector.load %arg4[%c0_5, %c0_6] : memref<16x48xbf16, #tpu.memory_space<vmem>>, vector<16x48xbf16>
    %7 = arith.extf %6 : vector<16x48xbf16> to vector<16x48xf32>
    %c0_7 = arith.constant 0 : index
    %c0_8 = arith.constant 0 : index
    %8 = vector.load %arg5[%c0_7, %c0_8] : memref<16x48xbf16, #tpu.memory_space<vmem>>, vector<16x48xbf16>
    %9 = arith.extf %8 : vector<16x48xbf16> to vector<16x48xf32>
    %cst = arith.constant dense<0.000000e+00> : vector<16xf32>
    %10 = vector.multi_reduction <add>, %1, %cst [1] : vector<16x48xf32> to vector<16xf32>
    %11 = vector.shape_cast %10 : vector<16xf32> to vector<16x1xf32>
    %cst_9 = arith.constant dense<0.000000e+00> : vector<16xf32>
    %12 = vector.multi_reduction <add>, %3, %cst_9 [1] : vector<16x48xf32> to vector<16xf32>
    %13 = vector.shape_cast %12 : vector<16xf32> to vector<16x1xf32>
    %14 = arith.addf %11, %13 : vector<16x1xf32>
    %cst_10 = arith.constant dense<0.000000e+00> : vector<16xf32>
    %15 = vector.multi_reduction <add>, %5, %cst_10 [1] : vector<16x48xf32> to vector<16xf32>
    %16 = vector.shape_cast %15 : vector<16xf32> to vector<16x1xf32>
    %17 = arith.addf %14, %16 : vector<16x1xf32>
    %cst_11 = arith.constant dense<0.000000e+00> : vector<16xf32>
    %18 = vector.multi_reduction <add>, %7, %cst_11 [1] : vector<16x48xf32> to vector<16xf32>
    %19 = vector.shape_cast %18 : vector<16xf32> to vector<16x1xf32>
    %20 = arith.addf %17, %19 : vector<16x1xf32>
    %cst_12 = arith.constant dense<0.000000e+00> : vector<16xf32>
    %21 = vector.multi_reduction <add>, %9, %cst_12 [1] : vector<16x48xf32> to vector<16xf32>
    %22 = vector.shape_cast %21 : vector<16xf32> to vector<16x1xf32>
    %23 = arith.addf %20, %22 : vector<16x1xf32>
    %cst_13 = arith.constant 0.00416666688 : f32
    %24 = vector.broadcast %cst_13 : f32 to vector<16x1xf32>
    %25 = arith.mulf %23, %24 : vector<16x1xf32>
    %cst_14 = arith.constant 0.000000e+00 : f32
    %26 = vector.broadcast %cst_14 : f32 to vector<16x1xf32>
    %27 = vector.broadcast %25 : vector<16x1xf32> to vector<16x48xf32>
    %28 = arith.subf %1, %27 : vector<16x48xf32>
    %29 = arith.mulf %28, %28 : vector<16x48xf32>
    %cst_15 = arith.constant dense<0.000000e+00> : vector<16xf32>
    %30 = vector.multi_reduction <add>, %29, %cst_15 [1] : vector<16x48xf32> to vector<16xf32>
    %31 = vector.shape_cast %30 : vector<16xf32> to vector<16x1xf32>
    %32 = arith.addf %26, %31 : vector<16x1xf32>
    %33 = vector.broadcast %25 : vector<16x1xf32> to vector<16x48xf32>
    %34 = arith.subf %3, %33 : vector<16x48xf32>
    %35 = arith.mulf %34, %34 : vector<16x48xf32>
    %cst_16 = arith.constant dense<0.000000e+00> : vector<16xf32>
    %36 = vector.multi_reduction <add>, %35, %cst_16 [1] : vector<16x48xf32> to vector<16xf32>
    %37 = vector.shape_cast %36 : vector<16xf32> to vector<16x1xf32>
    %38 = arith.addf %32, %37 : vector<16x1xf32>
    %39 = vector.broadcast %25 : vector<16x1xf32> to vector<16x48xf32>
    %40 = arith.subf %5, %39 : vector<16x48xf32>
    %41 = arith.mulf %40, %40 : vector<16x48xf32>
    %cst_17 = arith.constant dense<0.000000e+00> : vector<16xf32>
    %42 = vector.multi_reduction <add>, %41, %cst_17 [1] : vector<16x48xf32> to vector<16xf32>
    %43 = vector.shape_cast %42 : vector<16xf32> to vector<16x1xf32>
    %44 = arith.addf %38, %43 : vector<16x1xf32>
    %45 = vector.broadcast %25 : vector<16x1xf32> to vector<16x48xf32>
    %46 = arith.subf %7, %45 : vector<16x48xf32>
    %47 = arith.mulf %46, %46 : vector<16x48xf32>
    %cst_18 = arith.constant dense<0.000000e+00> : vector<16xf32>
    %48 = vector.multi_reduction <add>, %47, %cst_18 [1] : vector<16x48xf32> to vector<16xf32>
    %49 = vector.shape_cast %48 : vector<16xf32> to vector<16x1xf32>
    %50 = arith.addf %44, %49 : vector<16x1xf32>
    %51 = vector.broadcast %25 : vector<16x1xf32> to vector<16x48xf32>
    %52 = arith.subf %9, %51 : vector<16x48xf32>
    %53 = arith.mulf %52, %52 : vector<16x48xf32>
    %cst_19 = arith.constant dense<0.000000e+00> : vector<16xf32>
    %54 = vector.multi_reduction <add>, %53, %cst_19 [1] : vector<16x48xf32> to vector<16xf32>
    %55 = vector.shape_cast %54 : vector<16xf32> to vector<16x1xf32>
    %56 = arith.addf %50, %55 : vector<16x1xf32>
    %cst_20 = arith.constant 0.00416666688 : f32
    %57 = vector.broadcast %cst_20 : f32 to vector<16x1xf32>
    %58 = arith.mulf %56, %57 : vector<16x1xf32>
    %cst_21 = arith.constant 9.99999974E-6 : f32
    %59 = vector.broadcast %cst_21 : f32 to vector<16x1xf32>
    %60 = arith.addf %58, %59 : vector<16x1xf32>
    %61 = math.rsqrt %60 : vector<16x1xf32>
    %cst_22 = arith.constant 0.000000e+00 : f32
    %62 = vector.broadcast %cst_22 : f32 to vector<16x32xf32>
    %63 = vector.broadcast %25 : vector<16x1xf32> to vector<16x48xf32>
    %64 = arith.subf %1, %63 : vector<16x48xf32>
    %65 = vector.broadcast %61 : vector<16x1xf32> to vector<16x48xf32>
    %66 = arith.mulf %64, %65 : vector<16x48xf32>
    %67 = arith.truncf %66 : vector<16x48xf32> to vector<16x48xbf16>
    %c0_23 = arith.constant 0 : index
    %c0_24 = arith.constant 0 : index
    %68 = vector.load %arg6[%c0_23, %c0_24] : memref<240x32xbf16, #tpu.memory_space<vmem>>, vector<48x32xbf16>
    %cst_25 = arith.constant dense<0.000000e+00> : vector<16x32xf32>
    %69 = tpu.matmul %67, %68, %cst_25 {dimension_numbers = #tpu.dot_dimension_numbers<[1], [0], [0], [1], [0, 0, 1, 1], [], []>} : vector<16x48xbf16>, vector<48x32xbf16>, vector<16x32xf32> -> vector<16x32xf32>
    %70 = arith.addf %62, %69 : vector<16x32xf32>
    %71 = vector.broadcast %25 : vector<16x1xf32> to vector<16x48xf32>
    %72 = arith.subf %3, %71 : vector<16x48xf32>
    %73 = vector.broadcast %61 : vector<16x1xf32> to vector<16x48xf32>
    %74 = arith.mulf %72, %73 : vector<16x48xf32>
    %75 = arith.truncf %74 : vector<16x48xf32> to vector<16x48xbf16>
    %c48 = arith.constant 48 : index
    %c0_26 = arith.constant 0 : index
    %76 = vector.load %arg6[%c48, %c0_26] : memref<240x32xbf16, #tpu.memory_space<vmem>>, vector<48x32xbf16>
    %cst_27 = arith.constant dense<0.000000e+00> : vector<16x32xf32>
    %77 = tpu.matmul %75, %76, %cst_27 {dimension_numbers = #tpu.dot_dimension_numbers<[1], [0], [0], [1], [0, 0, 1, 1], [], []>} : vector<16x48xbf16>, vector<48x32xbf16>, vector<16x32xf32> -> vector<16x32xf32>
    %78 = arith.addf %70, %77 : vector<16x32xf32>
    %79 = vector.broadcast %25 : vector<16x1xf32> to vector<16x48xf32>
    %80 = arith.subf %5, %79 : vector<16x48xf32>
    %81 = vector.broadcast %61 : vector<16x1xf32> to vector<16x48xf32>
    %82 = arith.mulf %80, %81 : vector<16x48xf32>
    %83 = arith.truncf %82 : vector<16x48xf32> to vector<16x48xbf16>
    %c96 = arith.constant 96 : index
    %c0_28 = arith.constant 0 : index
    %84 = vector.load %arg6[%c96, %c0_28] : memref<240x32xbf16, #tpu.memory_space<vmem>>, vector<48x32xbf16>
    %cst_29 = arith.constant dense<0.000000e+00> : vector<16x32xf32>
    %85 = tpu.matmul %83, %84, %cst_29 {dimension_numbers = #tpu.dot_dimension_numbers<[1], [0], [0], [1], [0, 0, 1, 1], [], []>} : vector<16x48xbf16>, vector<48x32xbf16>, vector<16x32xf32> -> vector<16x32xf32>
    %86 = arith.addf %78, %85 : vector<16x32xf32>
    %87 = vector.broadcast %25 : vector<16x1xf32> to vector<16x48xf32>
    %88 = arith.subf %7, %87 : vector<16x48xf32>
    %89 = vector.broadcast %61 : vector<16x1xf32> to vector<16x48xf32>
    %90 = arith.mulf %88, %89 : vector<16x48xf32>
    %91 = arith.truncf %90 : vector<16x48xf32> to vector<16x48xbf16>
    %c144 = arith.constant 144 : index
    %c0_30 = arith.constant 0 : index
    %92 = vector.load %arg6[%c144, %c0_30] : memref<240x32xbf16, #tpu.memory_space<vmem>>, vector<48x32xbf16>
    %cst_31 = arith.constant dense<0.000000e+00> : vector<16x32xf32>
    %93 = tpu.matmul %91, %92, %cst_31 {dimension_numbers = #tpu.dot_dimension_numbers<[1], [0], [0], [1], [0, 0, 1, 1], [], []>} : vector<16x48xbf16>, vector<48x32xbf16>, vector<16x32xf32> -> vector<16x32xf32>
    %94 = arith.addf %86, %93 : vector<16x32xf32>
    %95 = vector.broadcast %25 : vector<16x1xf32> to vector<16x48xf32>
    %96 = arith.subf %9, %95 : vector<16x48xf32>
    %97 = vector.broadcast %61 : vector<16x1xf32> to vector<16x48xf32>
    %98 = arith.mulf %96, %97 : vector<16x48xf32>
    %99 = arith.truncf %98 : vector<16x48xf32> to vector<16x48xbf16>
    %c192 = arith.constant 192 : index
    %c0_32 = arith.constant 0 : index
    %100 = vector.load %arg6[%c192, %c0_32] : memref<240x32xbf16, #tpu.memory_space<vmem>>, vector<48x32xbf16>
    %cst_33 = arith.constant dense<0.000000e+00> : vector<16x32xf32>
    %101 = tpu.matmul %99, %100, %cst_33 {dimension_numbers = #tpu.dot_dimension_numbers<[1], [0], [0], [1], [0, 0, 1, 1], [], []>} : vector<16x48xbf16>, vector<48x32xbf16>, vector<16x32xf32> -> vector<16x32xf32>
    %102 = arith.addf %94, %101 : vector<16x32xf32>
    %c0_34 = arith.constant 0 : index
    %c0_35 = arith.constant 0 : index
    %103 = vector.load %arg7[%c0_34, %c0_35] : memref<1x32xf32, #tpu.memory_space<vmem>>, vector<1x32xf32>
    %104 = vector.broadcast %103 : vector<1x32xf32> to vector<16x32xf32>
    %105 = arith.addf %102, %104 : vector<16x32xf32>
    %c0_36 = arith.constant 0 : index
    %c0_37 = arith.constant 0 : index
    %106 = vector.load %arg8[%c0_36, %c0_37] : memref<16x32xf32, #tpu.memory_space<vmem>>, vector<16x32xf32>
    tpu.vector_store %arg8[%c0_36, %c0_37], %105 {strides = array<i32>} : memref<16x32xf32, #tpu.memory_space<vmem>>, vector<16x32xf32>,
    return
  }
  func.func @transform_0(%arg0: i32) -> (i32, i32) {
    %c0_i32 = arith.constant 0 : i32
    %c0_i32_0 = arith.constant 0 : i32
    return %arg0, %c0_i32 : i32, i32
  }
  func.func @transform_1(%arg0: i32) -> (i32, i32) {
    %c0_i32 = arith.constant 0 : i32
    %c0_i32_0 = arith.constant 0 : i32
    return %arg0, %c0_i32 : i32, i32
  }
  func.func @transform_2(%arg0: i32) -> (i32, i32) {
    %c0_i32 = arith.constant 0 : i32
    %c0_i32_0 = arith.constant 0 : i32
    return %arg0, %c0_i32 : i32, i32
  }
  func.func @transform_3(%arg0: i32) -> (i32, i32) {
    %c0_i32 = arith.constant 0 : i32
    %c0_i32_0 = arith.constant 0 : i32
    return %arg0, %c0_i32 : i32, i32
  }
  func.func @transform_4(%arg0: i32) -> (i32, i32) {
    %c0_i32 = arith.constant 0 : i32
    %c0_i32_0 = arith.constant 0 : i32
    return %arg0, %c0_i32 : i32, i32
  }
  func.func @transform_5(%arg0: i32) -> (i32, i32) {
    %c0_i32 = arith.constant 0 : i32
    %c0_i32_0 = arith.constant 0 : i32
    %c0_i32_1 = arith.constant 0 : i32
    return %c0_i32, %c0_i32_0 : i32, i32
  }
  func.func @transform_6(%arg0: i32) -> (i32, i32) {
    %c0_i32 = arith.constant 0 : i32
    %c0_i32_0 = arith.constant 0 : i32
    %c0_i32_1 = arith.constant 0 : i32
    return %c0_i32, %c0_i32_0 : i32, i32
  }
  func.func @transform_7(%arg0: i32) -> (i32, i32) {
    %c0_i32 = arith.constant 0 : i32
    %c0_i32_0 = arith.constant 0 : i32
    return %arg0, %c0_i32 : i32, i32
  }
}

</mosaic_0001>

<bundles_post_ra>
// kernel: tpu_custom_call.1
= control target key start
LH: loop header
LB: loop body
LE: loop exit
PB: predicated region body
PF: predicated region fallthrough
CT: control target
= control target key end

     0   :  { %12 = vsyncpa [#allocation3], 0  ;;  %s1569_s0 = inlined_call_operand.vmem [shape: bf16[32,48], index: 0, kind: input, shape index: {}]   ;;  %s1570_s1 = inlined_call_operand.vmem [shape: bf16[32,48], index: 1, kind: input, shape index: {}]   ;;  %s1571_s2 = inlined_call_operand.vmem [shape: bf16[32,48], index: 2, kind: input, shape index: {}]   ;;  %s1572_s3 = inlined_call_operand.vmem [shape: bf16[32,48], index: 3, kind: input, shape index: {}]   ;;  %s1573_s4 = inlined_call_operand.vmem [shape: bf16[32,48], index: 4, kind: input, shape index: {}]   ;;  %s1574_s5 = inlined_call_operand.vmem [shape: bf16[240,32], index: 5, kind: input, shape index: {}]   ;;  %s1575_s6 = inlined_call_operand.vmem [shape: f32[1,32], index: 6, kind: input, shape index: {}]   ;;  %s1576_s7 = inlined_call_operand.hbm [shape: f32[32,32], index: 7, kind: output, shape index: {}]  }
   0x1   :  { %14 = vsyncpa [#allocation3 + $0x1], 0  ;;  %s1296_s24 = smov 0   ;;  %s1298_s25 = smov 0  }
   0x2   :  { %s1300_s26 = smov 0   ;;  %s1302_s27 = smov 0  }
   0x3 LB: > { %s1317_s28 = sadd.s32 4294967295, %s1249_s27   ;;  %s993_s29 = sadd.s32 4294967294, %s1249_s27   ;;  %s1249_s27 = sphi %s1302_s27, %s1582_s27   ;;  %s1245_s26 = sphi %s1300_s26, %s1581_s26   ;;  %s1241_s25 = sphi %s1298_s25, %s1580_s25   ;;  %s1237_s24 = sphi %s1296_s24, %s1579_s24  }
   0x4   : > { %s1321_s30 = sadd.s32 1, %s1249_s27   ;;  %s199_s8 = sadd.s32 1, %s1245_s26 }
   0x5   : > { %s196_s9 = ssub.s32 %s1249_s27, %s1321_s30  ;;  %p209_p0 = scmp.ne.s32.totalorder %s1245_s26, %s1241_s25 }
   0x6   : > { %p197_p1 = scmp.eq.s32.totalorder %s196_s9, 0  ;;  %p210_p2 = scmp.eq.s32.totalorder %s1317_s28, 1 }
   0x7   : > { %p215_p3 = scmp.ne.s32.totalorder %s1241_s25, %s1237_s24  ;;  %p216_p4 = scmp.eq.s32.totalorder %s993_s29, 1 }
   0x8   : > { %s1332_s10 = scalar_select %p197_p1, %s1245_s26, %s199_s8  }
   0x9   : > { %p1334_p5 = por %p210_p2, %p209_p0  ;;  %p1338_p6 = por %p216_p4, %p215_p3 }
   0xa   : > { %p996_p7 = scmp.ge.s32.totalorder %s1249_s27, 1  ;;  %p285_p8 = scmp.lt.s32.totalorder %s1249_s27, 3 }
   0xc   : > { %p286_p9 = pnand %p996_p7, %p285_p8 }
   0xd   : > { %s998_s13 = sshll.u32 (!%p286_p9), %s1317_s28, 1  ;;  %vm389_vm0 = vcmask (!%p286_p9), 392192   ;;  %vm1252_vm1 = vmmov (!%p286_p9), 0   ;;  %s334_s18 = sand.u32 (!%p286_p9), 1, %s1241_s25   ;;  %vm866_vm2 = vcmask (!%p286_p9), 261120  }
   0xe   : > { %289 = sbr.rel (%p286_p9) target bundleno = 632 (0x278), region = 48  ;;  %p338_p10 = scmp.lt.s32.totalorder (!%p286_p9), %s998_s13, 3 }
   0xf   : > { %s997_s19 = sshll.u32 (!%p286_p9), %s334_s18, 4  ;;  %s1034_s29 = sshll.u32 (!%p286_p9), %s1317_s28, 8 }
  0x10   : > { %s336_s22 = scalar_lea.vmem (!%p286_p9), [#allocation2], %s997_s19  ;;  %s1528_s15 = scalar_lea.sflag (!%p286_p9), [#allocation3], %s334_s18 }
  0x15   : > { %s1584_s13 = smov (!%p338_p10, %s998_s13), 3 }
  0x16   : > { %s1345_s14 = sshll.u32 %s1584_s13, 2  ;;  %s1524_s13 = scalar_lea.hbm %s1576_s7, %s1034_s29 }
  0x17   : > { %s347_s17 = scalar_lea.vmem %s1570_s1, %s1345_s14  ;;  %s341_s20 = scalar_lea.vmem %s1569_s0, %s1345_s14 }
  0x18   : > { %v1355_v0 = vld [vmem:[%s347_s17] sm:$0xff]   ;;  %s353_s23 = scalar_lea.vmem %s1571_s2, %s1345_s14  ;;  %s359_s9 = scalar_lea.vmem %s1572_s3, %s1345_s14 }
  0x19   : > { %v1036_v1 = vld [vmem:[%s341_s20] sm:$0xff]   ;;  %v1041_v2 = vunpack.c.l.bf16 %v1355_v0  ;;  %v1042_v4 = vunpack.c.h.bf16 %v1355_v0  ;;  %s365_s16 = scalar_lea.vmem %s1573_s4, %s1345_s14 }
  0x1a   : > { %v1037_v3 = vunpack.c.l.bf16 %v1036_v1  ;;  %v1038_v5 = vunpack.c.h.bf16 %v1036_v1  ;;  %v1044_v6 = vld [vmem:[%s353_s23] sm:$0xff]   ;;  %s883_s23 = sshll.u32 %s336_s22, 4  ;;  %s1526_s23 = int_to_ptr.vmem [resolvable:$true] %s883_s23 }
  0x1b   : > { %v396_v7 = vsel %vm389_vm0, %v1041_v2, 0.0  ;;  %v399_v9 = vsel %vm389_vm0, %v1042_v4, 0.0  ;;  %v1048_v11 = vld [vmem:[%s359_s9] sm:$0xff]   ;;  %v1046_v12 = vunpack.c.h.bf16 %v1044_v6  ;;  %v1045_v13 = vunpack.c.l.bf16 %v1044_v6  ;;  %s1187_s28 = scalar_lea.vmem %s1526_s23, 256 }
  0x1c   : > { %v390_v8 = vsel %vm389_vm0, %v1037_v3, 0.0  ;;  %397 = vadd.xlane.f32.xlu1 %v396_v7  ;;  %v393_v10 = vsel %vm389_vm0, %v1038_v5, 0.0  ;;  %v1050_v16 = vunpack.c.h.bf16 %v1048_v11  ;;  %v1049_v17 = vunpack.c.l.bf16 %v1048_v11  ;;  %v1052_v18 = vld [vmem:[%s365_s16] sm:$0xff]   ;;  %v1168_v11 = vld [vmem:[%s1574_s5 + $0x18] sm:$0xff]   ;;  %p1188_p11 = scmp.ne.s32.totalorder %s1526_s23, %s1187_s28  ;;  %s1253_s16 = smov [#allocation2]  }
  0x1d   : > { %391 = vadd.xlane.f32.xlu0 %v390_v8  ;;  %v407_v14 = vsel %vm389_vm0, %v1046_v12, 0.0  ;;  %v404_v15 = vsel %vm389_vm0, %v1045_v13, 0.0  ;;  %v1054_v21 = vunpack.c.h.bf16 %v1052_v18  ;;  %v1053_v22 = vunpack.c.l.bf16 %v1052_v18  ;;  %s1191_s14 = sshll.u32 %s1253_s16, 4  ;;  %s1192_s14 = int_to_ptr.vmem [resolvable:$false] %s1191_s14 }
  0x1e   : > { %v415_v19 = vsel %vm389_vm0, %v1050_v16, 0.0  ;;  %v412_v20 = vsel %vm389_vm0, %v1049_v17, 0.0  ;;  %p1189_p12 = pnand %p1188_p11, %p1334_p5  ;;  %s1193_s17 = scalar_lea.vmem %s1192_s14, 512 }
  0x1f   : > { %v423_v23 = vsel %vm389_vm0, %v1054_v21, 0.0  ;;  %v420_v24 = vsel %vm389_vm0, %v1053_v22, 0.0  ;;  %p1194_p0 = scmp.lt.s32.totalorder %s1526_s23, %s1192_s14  ;;  %p1195_p1 = scmp.lt.s32.totalorder %s1193_s17, %s1187_s28 }
  0x20   : > { %400 = vadd.xlane.f32.xlu1 %v399_v9  ;;  %p1190_p13 = pneg %p1189_p12 }
  0x21   : > { %394 = vadd.xlane.f32.xlu0 %v393_v10  ;;  %p1196_p2 = por %p1195_p1, %p1194_p0 }
  0x23   : > { %p1197_p3 = pnand %p1196_p2, %p1190_p13 }
  0x24   : > { %408 = vadd.xlane.f32.xlu1 %v407_v14  ;;  %v1170_v14 = vld [vmem:[%s1574_s5 + $0x20] sm:$0xff]  }
  0x25   : > { %405 = vadd.xlane.f32.xlu0 %v404_v15  ;;  %v1171_v15 = vld [vmem:[%s1574_s5 + $0x8] sm:$0xff]  }
  0x28   : > { %416 = vadd.xlane.f32.xlu1 %v415_v19 }
  0x29   : > { %413 = vadd.xlane.f32.xlu0 %v412_v20 }
  0x2c   : > { %424 = vadd.xlane.f32.xlu1 %v423_v23 }
  0x2d   : > { %421 = vadd.xlane.f32.xlu0 %v420_v24 }
  0xa9   : > { %v398_v25 = vpop.xlane.xlu1 %397 }
  0xaa   : > { %v392_v26 = vpop.xlane.xlu0 %391 }
  0xab   : > { %v402_v31 = vadd.f32 %v398_v25, %v392_v26 }
  0xad   : > { %v401_v27 = vpop.xlane.xlu1 %400 }
  0xae   : > { %v395_v28 = vpop.xlane.xlu0 %394 }
  0xaf   : > { %v403_v32 = vadd.f32 %v401_v27, %v395_v28 }
  0xb1   : > { %v409_v29 = vpop.xlane.xlu1 %408 }
  0xb2   : > { %v406_v30 = vpop.xlane.xlu0 %405  ;;  %v411_v35 = vadd.f32 %v409_v29, %v403_v32 }
  0xb3   : > { %v410_v36 = vadd.f32 %v406_v30, %v402_v31 }
  0xb5   : > { %v417_v33 = vpop.xlane.xlu1 %416 }
  0xb6   : > { %v414_v34 = vpop.xlane.xlu0 %413  ;;  %v419_v37 = vadd.f32 %v417_v33, %v411_v35 }
  0xb7   : > { %v418_v38 = vadd.f32 %v414_v34, %v410_v36 }
  0xb9   : > { %v425_v39 = vpop.xlane.xlu1 %424 }
  0xba   : > { %v422_v40 = vpop.xlane.xlu0 %421  ;;  %v427_v41 = vadd.f32 %v425_v39, %v419_v37 }
  0xbb   : > { %v426_v42 = vadd.f32 %v422_v40, %v418_v38 }
  0xbc   : > { %v429_v43 = vmul.f32 0.004166667, %v427_v41 }
  0xbd   : > { %v428_v44 = vmul.f32 0.004166667, %v426_v42 }
  0xbe   : > { %v1381_v45 = vsub.f32 %v1038_v5, %v429_v43  ;;  %v1385_v47 = vsub.f32 %v1042_v4, %v429_v43  ;;  %v1393_v51 = vsub.f32 %v1046_v12, %v429_v43  ;;  %v1403_v57 = vsub.f32 %v1050_v16, %v429_v43  ;;  %v1169_v12 = vld [vmem:[%s1574_s5] sm:$0xff]   ;;  %v1172_v16 = vld [vmem:[%s1574_s5 + $0x28] sm:$0xff]  }
  0xbf   : > { %v1383_v46 = vsub.f32 %v1037_v3, %v428_v44  ;;  %v1387_v48 = vsub.f32 %v1041_v2, %v428_v44  ;;  %v1395_v52 = vsub.f32 %v1045_v13, %v428_v44  ;;  %v1405_v58 = vsub.f32 %v1049_v17, %v428_v44  ;;  %v1173_v17 = vld [vmem:[%s1574_s5 + $0x10] sm:$0xff]  }
  0xc0   : > { %v433_v49 = vmul.f32 %v1381_v45, %v1381_v45  ;;  %v445_v55 = vmul.f32 %v1385_v47, %v1385_v47  ;;  %v457_v61 = vmul.f32 %v1393_v51, %v1393_v51  ;;  %v469_v63 = vmul.f32 %v1403_v57, %v1403_v57 }
  0xc1   : > { %v432_v50 = vmul.f32 %v1383_v46, %v1383_v46  ;;  %v444_v56 = vmul.f32 %v1387_v48, %v1387_v48  ;;  %v456_v62 = vmul.f32 %v1395_v52, %v1395_v52  ;;  %v468_v0 = vmul.f32 %v1405_v58, %v1405_v58 }
  0xc2   : > { %v437_v53 = vsel %vm389_vm0, %v433_v49, 0.0  ;;  %v449_v59 = vsel %vm389_vm0, %v445_v55, 0.0  ;;  %v461_v1 = vsel %vm389_vm0, %v457_v61, 0.0  ;;  %v1419_v3 = vsub.f32 %v1054_v21, %v429_v43 }
  0xc3   : > { %v434_v54 = vsel %vm389_vm0, %v432_v50, 0.0  ;;  %438 = vadd.xlane.f32.xlu1 %v437_v53  ;;  %v446_v60 = vsel %vm389_vm0, %v444_v56, 0.0  ;;  %v458_v2 = vsel %vm389_vm0, %v456_v62, 0.0  ;;  %v1421_v4 = vsub.f32 %v1053_v22, %v428_v44  ;;  %v1174_v50 = vld [vmem:[%s1574_s5 + $0x30] sm:$0xff]   ;;  %v1175_v53 = vld [vmem:[%s1574_s5 + $0x48] sm:$0xff]   ;;  %v1180_v62 = vld [vmem:[%s1574_s5 + $0x60] sm:$0xff]  }
  0xc4   : > { %435 = vadd.xlane.f32.xlu0 %v434_v54  ;;  %v473_v5 = vsel %vm389_vm0, %v469_v63, 0.0  ;;  %v470_v6 = vsel %vm389_vm0, %v468_v0, 0.0  ;;  %v481_v7 = vmul.f32 %v1419_v3, %v1419_v3  ;;  %v1251_v13 = vmov 0.0  }
  0xc5   : > { %v480_v8 = vmul.f32 %v1421_v4, %v1421_v4  ;;  %1075 = vmatprep.subr.bf16.mxu0 %v1251_v13  ;;  %1085 = vmatprep.subr.bf16.mxu1 %v1251_v13 }
  0xc6   : > { %v485_v9 = vsel %vm389_vm0, %v481_v7, 0.0  ;;  %1076 = vmatpush3.bf16.msra.mxu0 %v1168_v11  ;;  %1086 = vmatpush3.bf16.msra.mxu1 %v1169_v12 }
  0xc7   : > { %450 = vadd.xlane.f32.xlu1 %v449_v59  ;;  %v482_v10 = vsel %vm389_vm0, %v480_v8, 0.0  ;;  %1077 = vmatprep.subr.bf16.mxu0 %v1251_v13 }
  0xc8   : > { %447 = vadd.xlane.f32.xlu0 %v446_v60  ;;  %1087 = vmatprep.subr.bf16.mxu1 %v1251_v13 }
  0xc9   : > { %1081 = vmatprep.mubr.msk.bf16.mxu0 %vm1252_vm1, %v1251_v13  ;;  %1091 = vmatprep.mubr.msk.bf16.mxu1 %vm1252_vm1, %v1251_v13 }
  0xca   : > { %1078 = vmatpush3.bf16.msra.mxu0 %v1170_v14  ;;  %1088 = vmatpush3.bf16.msra.mxu1 %v1171_v15 }
  0xcb   : > { %462 = vadd.xlane.f32.xlu1 %v461_v1  ;;  %1079 = vmatprep.subr.bf16.mxu0 %v1251_v13 }
  0xcc   : > { %459 = vadd.xlane.f32.xlu0 %v458_v2  ;;  %1089 = vmatprep.subr.bf16.mxu1 %v1251_v13 }
  0xce   : > { %1080 = vmatpush3.bf16.msra.mxu0 %v1172_v16  ;;  %1090 = vmatpush3.bf16.msra.mxu1 %v1173_v17 }
  0xcf   : > { %474 = vadd.xlane.f32.xlu1 %v473_v5  ;;  %1095 = vmatprep.subr.bf16.mxu0 %v1251_v13 }
  0xd0   : > { %471 = vadd.xlane.f32.xlu0 %v470_v6  ;;  %1105 = vmatprep.subr.bf16.mxu1 %v1251_v13 }
  0xd3   : > { %486 = vadd.xlane.f32.xlu1 %v485_v9 }
  0xd4   : > { %483 = vadd.xlane.f32.xlu0 %v482_v10 }
 0x150   : > { %v439_v18 = vpop.xlane.xlu1 %438 }
 0x151   : > { %v436_v19 = vpop.xlane.xlu0 %435 }
 0x154   : > { %v451_v20 = vpop.xlane.xlu1 %450 }
 0x155   : > { %v448_v21 = vpop.xlane.xlu0 %447  ;;  %v453_v24 = vadd.f32 %v451_v20, %v439_v18 }
 0x156   : > { %v452_v25 = vadd.f32 %v448_v21, %v436_v19 }
 0x158   : > { %v463_v22 = vpop.xlane.xlu1 %462 }
 0x159   : > { %v460_v23 = vpop.xlane.xlu0 %459  ;;  %v465_v28 = vadd.f32 %v463_v22, %v453_v24 }
 0x15a   : > { %v464_v29 = vadd.f32 %v460_v23, %v452_v25  ;;  %v1028_v25 = vld [vmem:[%s1575_s6] ss:$0 sm:$0xff] }
 0x15c   : > { %v475_v26 = vpop.xlane.xlu1 %474 }
 0x15d   : > { %v472_v27 = vpop.xlane.xlu0 %471  ;;  %v477_v30 = vadd.f32 %v475_v26, %v465_v28 }
 0x15e   : > { %v476_v31 = vadd.f32 %v472_v27, %v464_v29 }
 0x160   : > { %v487_v32 = vpop.xlane.xlu1 %486 }
 0x161   : > { %v484_v33 = vpop.xlane.xlu0 %483  ;;  %v489_v34 = vadd.f32 %v487_v32, %v477_v30 }
 0x162   : > { %v488_v35 = vadd.f32 %v484_v33, %v476_v31 }
 0x163   : > { %v491_v36 = vmul.f32 0.004166667, %v489_v34 }
 0x164   : > { %v490_v37 = vmul.f32 0.004166667, %v488_v35 }
 0x165   : > { %v493_v38 = vadd.f32 1e-05, %v491_v36 }
 0x166   : > { %v492_v39 = vadd.f32 1e-05, %v490_v37 }
 0x167   : > { %1183 = vrsqrt.f32 %v493_v38 }
 0x168   : > { %1185 = vrsqrt.f32 %v492_v39 }
 0x171   : > { %v1184_v40 = vpop.eup %1183 }
 0x172   : > { %v1186_v41 = vpop.eup %1185  ;;  %v506_v42 = vmul.f32 %v1184_v40, %v1385_v47  ;;  %v497_v43 = vmul.f32 %v1184_v40, %v1381_v45  ;;  %v1176_v45 = vld [vmem:[%s1574_s5 + $0x38] sm:$0xff]   ;;  %v1178_v47 = vld [vmem:[%s1574_s5 + $0x40] sm:$0xff]   ;;  %v639_v56 = vmul.f32 %v1184_v40, %v1393_v51  ;;  %v712_v61 = vmul.f32 %v1184_v40, %v1403_v57  ;;  %v1181_v51 = vld [vmem:[%s1574_s5 + $0x68] sm:$0xff]  }
 0x173   : > { %v505_v44 = vmul.f32 %v1186_v41, %v1387_v48  ;;  %v496_v49 = vmul.f32 %v1186_v41, %v1383_v46  ;;  %v1177_v46 = vld [vmem:[%s1574_s5 + $0x50] sm:$0xff]   ;;  %v1179_v48 = vld [vmem:[%s1574_s5 + $0x58] sm:$0xff]   ;;  %v638_v59 = vmul.f32 %v1186_v41, %v1395_v52  ;;  %v711_v60 = vmul.f32 %v1186_v41, %v1405_v58 }
 0x174   : > { %v1182_v52 = vld [vmem:[%s1574_s5 + $0x70] sm:$0xff]   ;;  %v784_v57 = vmul.f32 %v1186_v41, %v1421_v4  ;;  %v785_v58 = vmul.f32 %v1184_v40, %v1419_v3 }
 0x175   : > { %v507_v54 = vpack.c.bf16 %v506_v42, %v505_v44  ;;  %v498_v55 = vpack.c.bf16 %v497_v43, %v496_v49  ;;  %v640_v63 = vpack.c.bf16 %v639_v56, %v638_v59  ;;  %v713_v0 = vpack.c.bf16 %v712_v61, %v711_v60 }
 0x176   : > { %v786_v1 = vpack.c.bf16 %v785_v58, %v784_v57 }
 0x177   : > { %1082 = vmatmul.mubr.msk.bf16.vlgmr.msra.gmra.mrb[0].mxu0 %vm389_vm0, %v507_v54  ;;  %1092 = vmatmul.mubr.msk.bf16.vlgmr.msra.gmra.mrb[0].mxu1 %vm389_vm0, %v498_v55 }
 0x178   : > { %1096 = vmatpush3.bf16.msra.mxu0 %v1174_v50  ;;  %1106 = vmatpush3.bf16.msra.mxu1 %v1175_v53 }
 0x179   : > { %1097 = vmatprep.subr.bf16.mxu0 %v1251_v13  ;;  %1107 = vmatprep.subr.bf16.mxu1 %v1251_v13 }
 0x17a   : > { %1101 = vmatprep.mubr.msk.bf16.mxu0 %vm1252_vm1, %v1251_v13  ;;  %1111 = vmatprep.mubr.msk.bf16.mxu1 %vm1252_vm1, %v1251_v13 }
 0x17c   : > { %1098 = vmatpush3.bf16.msra.mxu0 %v1176_v45  ;;  %1108 = vmatpush3.bf16.msra.mxu1 %v1177_v46 }
 0x17d   : > { %1099 = vmatprep.subr.bf16.mxu0 %v1251_v13  ;;  %1109 = vmatprep.subr.bf16.mxu1 %v1251_v13 }
 0x180   : > { %1100 = vmatpush3.bf16.msra.mxu0 %v1178_v47  ;;  %1110 = vmatpush3.bf16.msra.mxu1 %v1179_v48 }
 0x181   : > { %1115 = vmatprep.subr.bf16.mxu0 %v1251_v13 }
 0x183   : > { %1102 = vmatmul.mubr.msk.bf16.vlgmr.msra.gmra.mrb[4].mxu0 %vm389_vm0, %v640_v63  ;;  %1112 = vmatmul.mubr.msk.bf16.vlgmr.msra.gmra.mrb[4].mxu1 %vm389_vm0, %v713_v0 }
 0x184   : > { %1116 = vmatpush3.bf16.msra.mxu0 %v1180_v62  ;;  %1121 = vmatprep.mubr.msk.bf16.mxu0 %vm1252_vm1, %v1251_v13 }
 0x185   : > { %1117 = vmatprep.subr.bf16.mxu0 %v1251_v13 }
 0x188   : > { %1118 = vmatpush3.bf16.msra.mxu0 %v1181_v51 }
 0x189   : > { %1119 = vmatprep.subr.bf16.mxu0 %v1251_v13 }
 0x18c   : > { %1120 = vmatpush3.bf16.msra.mxu0 %v1182_v52 }
 0x18f   : > { %1122 = vmatmul.mubr.msk.bf16.vlgmr.msra.gmra.mrb[8].mxu0 %vm389_vm0, %v786_v1 }
 0x24a   : > { %v569_v2 = vpop.f32.mrb[0].mxu0  ;;  %v631_v5 = vpop.f32.mrb[0].mxu1 }
 0x24b   : > { %v632_v6 = vadd.f32 %v631_v5, %v569_v2  ;;  %v1083_v7 = vpop.f32.mrb[1].mxu0  ;;  %v1093_v8 = vpop.f32.mrb[1].mxu1 }
 0x24c   : > { %v572_v9 = vpop.f32.mrb[2].mxu0  ;;  %v634_v10 = vpop.f32.mrb[2].mxu1 }
 0x24d   : > { %v635_v11 = vadd.f32 %v634_v10, %v572_v9  ;;  %v1084_v12 = vpop.f32.mrb[3].mxu0  ;;  %v1094_v14 = vpop.f32.mrb[3].mxu1 }
 0x256   : > { %v702_v13 = vpop.f32.mrb[4].mxu0  ;;  %v775_v15 = vpop.f32.mrb[4].mxu1 }
 0x257   : > { %v709_v4 = vadd.f32 %v702_v13, %v632_v6  ;;  %v1103_v16 = vpop.f32.mrb[5].mxu0  ;;  %v1113_v3 = vpop.f32.mrb[5].mxu1 }
 0x258   : > { %v705_v17 = vpop.f32.mrb[6].mxu0  ;;  %v778_v18 = vpop.f32.mrb[6].mxu1 }
 0x259   : > { %v782_v19 = vadd.f32 %v775_v15, %v709_v4  ;;  %v710_v20 = vadd.f32 %v705_v17, %v635_v11  ;;  %v1104_v21 = vpop.f32.mrb[7].mxu0  ;;  %v1114_v22 = vpop.f32.mrb[7].mxu1 }
 0x25b   : > { %v783_v23 = vadd.f32 %v778_v18, %v710_v20 }
 0x262   : > { %v848_v24 = vpop.f32.mrb[8].mxu0 }
 0x263   : > { %v855_v26 = vadd.f32 %v848_v24, %v782_v19  ;;  %v1123_v27 = vpop.f32.mrb[9].mxu0 }
 0x264   : > { %v851_v28 = vpop.f32.mrb[10].mxu0 }
 0x265   : > { %v864_v29 = vadd.f32 %v1028_v25, %v855_v26  ;;  %v856_v30 = vadd.f32 %v851_v28, %v783_v23  ;;  %v1124_v31 = vpop.f32.mrb[11].mxu0 }
 0x267   : > { %867 = vst.msk [vmem:[%s336_s22] sm:$0xff] %vm866_vm2, %v864_v29  ;;  %v865_v32 = vadd.f32 %v1028_v25, %v856_v30 }
 0x269   : > { %868 = vst.msk [vmem:[%s336_s22 + $0x8] sm:$0xff] %vm866_vm2, %v865_v32 }
 0x26a   : > { %1200 = shalt.err (!%p1197_p3)
}
 0x26b   : > { %s1201_s18 = scalar_lea.hbm %s1524_s13, 256  ;;  %s1205_s21 = scalar_lea.hbm %s1576_s7, 512 }
 0x26c   : > { %p1202_p4 = scmp.ne.s32.totalorder %s1524_s13, %s1201_s18  ;;  %p1206_p9 = scmp.lt.u32.totalorder %s1524_s13, %s1576_s7 }
 0x26d   : > { %p1207_p10 = scmp.lt.u32.totalorder %s1205_s21, %s1201_s18  ;;  %p1209_p12 = scmp.lt.u32.totalorder %s1201_s18, %s1524_s13 }
 0x26e   : > { %p1203_p7 = pnand %p1202_p4, %p1334_p5 }
 0x26f   : > { %p1208_p11 = por %p1207_p10, %p1206_p9 }
 0x270   : > { %p1204_p8 = pneg %p1203_p7 }
 0x271   : > { %p1210_p13 = por %p1209_p12, %p1208_p11 }
 0x273   : > { %p1211_p0 = pnand %p1210_p13, %p1204_p8 }
 0x275   : > { %1214 = shalt.err (!%p1211_p0)
}
 0x276   : > { %s1254_s8 = smov 128   ;;  %s1255_s9 = smov 8  }
 0x277   : > { %1125 = dma.vmem_to_hbm [thread:$0]  (%p1334_p5), %s1526_s23, 256, %s1524_s13, %s1528_s15, %s1254_s8, %s1254_s8, %s1255_s9  }
 0x278 PF: > { %p1131_p1 = scmp.ge.s32.totalorder %s1249_s27, 2  ;;  %s898_s28 = sand.u32 1, %s1237_s24  }
 0x279   : > { %s899_s16 = scalar_lea.sflag [#allocation3], %s898_s28 }
 0x27a   : > { %p1128_p2 = pnand %p1131_p1, %p1338_p6 }
 0x27c   : > { %1232 = dma.done.wait (!%p1128_p2), %s899_s16, 256  }
 0x27d   : > { %1234 = vsyncadd (!%p1128_p2), %s899_s16, 4294967040  ;;  %p17_p3 = scmp.ge.s32.totalorder %s1321_s30, 4   ;;  %s1579_s24 = smov %s1241_s25 }
 0x27e   : > { %s1580_s25 = smov %s1245_s26  ;;  %s1581_s26 = smov %s1332_s10 }
 0x27f   : > { %s1582_s27 = smov %s1321_s30  ;;  %19 = sbr.rel (!%p17_p3) target bundleno = 3 (0x3), region = 95 }
 0x286   :  { %904 = vsyncpa [#allocation3], 1 }
 0x287   :  { %906 = vsyncpa [#allocation3 + $0x1], 1 }

// kernel: tpu_custom_call.1
= control target key start
LH: loop header
LB: loop body
LE: loop exit
PB: predicated region body
PF: predicated region fallthrough
CT: control target
= control target key end

     0   :  { %12 = vsyncpa [#allocation3], 0  ;;  %s1569_s0 = inlined_call_operand.vmem [shape: bf16[32,48], index: 0, kind: input, shape index: {}]   ;;  %s1570_s1 = inlined_call_operand.vmem [shape: bf16[32,48], index: 1, kind: input, shape index: {}]   ;;  %s1571_s2 = inlined_call_operand.vmem [shape: bf16[32,48], index: 2, kind: input, shape index: {}]   ;;  %s1572_s3 = inlined_call_operand.vmem [shape: bf16[32,48], index: 3, kind: input, shape index: {}]   ;;  %s1573_s4 = inlined_call_operand.vmem [shape: bf16[32,48], index: 4, kind: input, shape index: {}]   ;;  %s1574_s5 = inlined_call_operand.vmem [shape: bf16[240,32], index: 5, kind: input, shape index: {}]   ;;  %s1575_s6 = inlined_call_operand.vmem [shape: f32[1,32], index: 6, kind: input, shape index: {}]   ;;  %s1576_s7 = inlined_call_operand.hbm [shape: f32[32,32], index: 7, kind: output, shape index: {}]  }
   0x1   :  { %14 = vsyncpa [#allocation3 + $0x1], 0  ;;  %s1296_s24 = smov 0   ;;  %s1298_s25 = smov 0  }
   0x2   :  { %s1300_s26 = smov 0   ;;  %s1302_s27 = smov 0  }
   0x3 LB: > { %s1317_s28 = sadd.s32 4294967295, %s1249_s27   ;;  %s993_s29 = sadd.s32 4294967294, %s1249_s27   ;;  %s1249_s27 = sphi %s1302_s27, %s1582_s27   ;;  %s1245_s26 = sphi %s1300_s26, %s1581_s26   ;;  %s1241_s25 = sphi %s1298_s25, %s1580_s25   ;;  %s1237_s24 = sphi %s1296_s24, %s1579_s24  }
   0x4   : > { %s1321_s30 = sadd.s32 1, %s1249_s27   ;;  %s199_s8 = sadd.s32 1, %s1245_s26 }
   0x5   : > { %s196_s9 = ssub.s32 %s1249_s27, %s1321_s30  ;;  %p209_p0 = scmp.ne.s32.totalorder %s1245_s26, %s1241_s25 }
   0x6   : > { %p197_p1 = scmp.eq.s32.totalorder %s196_s9, 0  ;;  %p210_p2 = scmp.eq.s32.totalorder %s1317_s28, 1 }
   0x7   : > { %p215_p3 = scmp.ne.s32.totalorder %s1241_s25, %s1237_s24  ;;  %p216_p4 = scmp.eq.s32.totalorder %s993_s29, 1 }
   0x8   : > { %s1332_s10 = scalar_select %p197_p1, %s1245_s26, %s199_s8  }
   0x9   : > { %p1334_p5 = por %p210_p2, %p209_p0  ;;  %p1338_p6 = por %p216_p4, %p215_p3 }
   0xa   : > { %p996_p7 = scmp.ge.s32.totalorder %s1249_s27, 1  ;;  %p285_p8 = scmp.lt.s32.totalorder %s1249_s27, 3 }
   0xc   : > { %p286_p9 = pnand %p996_p7, %p285_p8 }
   0xd   : > { %s998_s13 = sshll.u32 (!%p286_p9), %s1317_s28, 1  ;;  %vm389_vm0 = vcmask (!%p286_p9), 392192   ;;  %vm1252_vm1 = vmmov (!%p286_p9), 0   ;;  %s334_s18 = sand.u32 (!%p286_p9), 1, %s1241_s25   ;;  %vm866_vm2 = vcmask (!%p286_p9), 261120  }
   0xe   : > { %289 = sbr.rel (%p286_p9) target bundleno = 632 (0x278), region = 48  ;;  %p338_p10 = scmp.lt.s32.totalorder (!%p286_p9), %s998_s13, 3 }
   0xf   : > { %s997_s19 = sshll.u32 (!%p286_p9), %s334_s18, 4  ;;  %s1034_s29 = sshll.u32 (!%p286_p9), %s1317_s28, 8 }
  0x10   : > { %s336_s22 = scalar_lea.vmem (!%p286_p9), [#allocation2], %s997_s19  ;;  %s1528_s15 = scalar_lea.sflag (!%p286_p9), [#allocation3], %s334_s18 }
  0x15   : > { %s1584_s13 = smov (!%p338_p10, %s998_s13), 3 }
  0x16   : > { %s1345_s14 = sshll.u32 %s1584_s13, 2  ;;  %s1524_s13 = scalar_lea.hbm %s1576_s7, %s1034_s29 }
  0x17   : > { %s347_s17 = scalar_lea.vmem %s1570_s1, %s1345_s14  ;;  %s341_s20 = scalar_lea.vmem %s1569_s0, %s1345_s14 }
  0x18   : > { %v1355_v0 = vld [vmem:[%s347_s17] sm:$0xff]   ;;  %s353_s23 = scalar_lea.vmem %s1571_s2, %s1345_s14  ;;  %s359_s9 = scalar_lea.vmem %s1572_s3, %s1345_s14 }
  0x19   : > { %v1036_v1 = vld [vmem:[%s341_s20] sm:$0xff]   ;;  %v1041_v2 = vunpack.c.l.bf16 %v1355_v0  ;;  %v1042_v4 = vunpack.c.h.bf16 %v1355_v0  ;;  %s365_s16 = scalar_lea.vmem %s1573_s4, %s1345_s14 }
  0x1a   : > { %v1037_v3 = vunpack.c.l.bf16 %v1036_v1  ;;  %v1038_v5 = vunpack.c.h.bf16 %v1036_v1  ;;  %v1044_v6 = vld [vmem:[%s353_s23] sm:$0xff]   ;;  %s883_s23 = sshll.u32 %s336_s22, 4  ;;  %s1526_s23 = int_to_ptr.vmem [resolvable:$true] %s883_s23 }
  0x1b   : > { %v396_v7 = vsel %vm389_vm0, %v1041_v2, 0.0  ;;  %v399_v9 = vsel %vm389_vm0, %v1042_v4, 0.0  ;;  %v1048_v11 = vld [vmem:[%s359_s9] sm:$0xff]   ;;  %v1046_v12 = vunpack.c.h.bf16 %v1044_v6  ;;  %v1045_v13 = vunpack.c.l.bf16 %v1044_v6  ;;  %s1187_s28 = scalar_lea.vmem %s1526_s23, 256 }
  0x1c   : > { %v390_v8 = vsel %vm389_vm0, %v1037_v3, 0.0  ;;  %397 = vadd.xlane.f32.xlu1 %v396_v7  ;;  %v393_v10 = vsel %vm389_vm0, %v1038_v5, 0.0  ;;  %v1050_v16 = vunpack.c.h.bf16 %v1048_v11  ;;  %v1049_v17 = vunpack.c.l.bf16 %v1048_v11  ;;  %v1052_v18 = vld [vmem:[%s365_s16] sm:$0xff]   ;;  %v1168_v11 = vld [vmem:[%s1574_s5 + $0x18] sm:$0xff]   ;;  %p1188_p11 = scmp.ne.s32.totalorder %s1526_s23, %s1187_s28  ;;  %s1253_s16 = smov [#allocation2]  }
  0x1d   : > { %391 = vadd.xlane.f32.xlu0 %v390_v8  ;;  %v407_v14 = vsel %vm389_vm0, %v1046_v12, 0.0  ;;  %v404_v15 = vsel %vm389_vm0, %v1045_v13, 0.0  ;;  %v1054_v21 = vunpack.c.h.bf16 %v1052_v18  ;;  %v1053_v22 = vunpack.c.l.bf16 %v1052_v18  ;;  %s1191_s14 = sshll.u32 %s1253_s16, 4  ;;  %s1192_s14 = int_to_ptr.vmem [resolvable:$false] %s1191_s14 }
  0x1e   : > { %v415_v19 = vsel %vm389_vm0, %v1050_v16, 0.0  ;;  %v412_v20 = vsel %vm389_vm0, %v1049_v17, 0.0  ;;  %p1189_p12 = pnand %p1188_p11, %p1334_p5  ;;  %s1193_s17 = scalar_lea.vmem %s1192_s14, 512 }
  0x1f   : > { %v423_v23 = vsel %vm389_vm0, %v1054_v21, 0.0  ;;  %v420_v24 = vsel %vm389_vm0, %v1053_v22, 0.0  ;;  %p1194_p0 = scmp.lt.s32.totalorder %s1526_s23, %s1192_s14  ;;  %p1195_p1 = scmp.lt.s32.totalorder %s1193_s17, %s1187_s28 }
  0x20   : > { %400 = vadd.xlane.f32.xlu1 %v399_v9  ;;  %p1190_p13 = pneg %p1189_p12 }
  0x21   : > { %394 = vadd.xlane.f32.xlu0 %v393_v10  ;;  %p1196_p2 = por %p1195_p1, %p1194_p0 }
  0x23   : > { %p1197_p3 = pnand %p1196_p2, %p1190_p13 }
  0x24   : > { %408 = vadd.xlane.f32.xlu1 %v407_v14  ;;  %v1170_v14 = vld [vmem:[%s1574_s5 + $0x20] sm:$0xff]  }
  0x25   : > { %405 = vadd.xlane.f32.xlu0 %v404_v15  ;;  %v1171_v15 = vld [vmem:[%s1574_s5 + $0x8] sm:$0xff]  }
  0x28   : > { %416 = vadd.xlane.f32.xlu1 %v415_v19 }
  0x29   : > { %413 = vadd.xlane.f32.xlu0 %v412_v20 }
  0x2c   : > { %424 = vadd.xlane.f32.xlu1 %v423_v23 }
  0x2d   : > { %421 = vadd.xlane.f32.xlu0 %v420_v24 }
  0xa9   : > { %v398_v25 = vpop.xlane.xlu1 %397 }
  0xaa   : > { %v392_v26 = vpop.xlane.xlu0 %391 }
  0xab   : > { %v402_v31 = vadd.f32 %v398_v25, %v392_v26 }
  0xad   : > { %v401_v27 = vpop.xlane.xlu1 %400 }
  0xae   : > { %v395_v28 = vpop.xlane.xlu0 %394 }
  0xaf   : > { %v403_v32 = vadd.f32 %v401_v27, %v395_v28 }
  0xb1   : > { %v409_v29 = vpop.xlane.xlu1 %408 }
  0xb2   : > { %v406_v30 = vpop.xlane.xlu0 %405  ;;  %v411_v35 = vadd.f32 %v409_v29, %v403_v32 }
  0xb3   : > { %v410_v36 = vadd.f32 %v406_v30, %v402_v31 }
  0xb5   : > { %v417_v33 = vpop.xlane.xlu1 %416 }
  0xb6   : > { %v414_v34 = vpop.xlane.xlu0 %413  ;;  %v419_v37 = vadd.f32 %v417_v33, %v411_v35 }
  0xb7   : > { %v418_v38 = vadd.f32 %v414_v34, %v410_v36 }
  0xb9   : > { %v425_v39 = vpop.xlane.xlu1 %424 }
  0xba   : > { %v422_v40 = vpop.xlane.xlu0 %421  ;;  %v427_v41 = vadd.f32 %v425_v39, %v419_v37 }
  0xbb   : > { %v426_v42 = vadd.f32 %v422_v40, %v418_v38 }
  0xbc   : > { %v429_v43 = vmul.f32 0.004166667, %v427_v41 }
  0xbd   : > { %v428_v44 = vmul.f32 0.004166667, %v426_v42 }
  0xbe   : > { %v1381_v45 = vsub.f32 %v1038_v5, %v429_v43  ;;  %v1385_v47 = vsub.f32 %v1042_v4, %v429_v43  ;;  %v1393_v51 = vsub.f32 %v1046_v12, %v429_v43  ;;  %v1403_v57 = vsub.f32 %v1050_v16, %v429_v43  ;;  %v1169_v12 = vld [vmem:[%s1574_s5] sm:$0xff]   ;;  %v1172_v16 = vld [vmem:[%s1574_s5 + $0x28] sm:$0xff]  }
  0xbf   : > { %v1383_v46 = vsub.f32 %v1037_v3, %v428_v44  ;;  %v1387_v48 = vsub.f32 %v1041_v2, %v428_v44  ;;  %v1395_v52 = vsub.f32 %v1045_v13, %v428_v44  ;;  %v1405_v58 = vsub.f32 %v1049_v17, %v428_v44  ;;  %v1173_v17 = vld [vmem:[%s1574_s5 + $0x10] sm:$0xff]  }
  0xc0   : > { %v433_v49 = vmul.f32 %v1381_v45, %v1381_v45  ;;  %v445_v55 = vmul.f32 %v1385_v47, %v1385_v47  ;;  %v457_v61 = vmul.f32 %v1393_v51, %v1393_v51  ;;  %v469_v63 = vmul.f32 %v1403_v57, %v1403_v57 }
  0xc1   : > { %v432_v50 = vmul.f32 %v1383_v46, %v1383_v46  ;;  %v444_v56 = vmul.f32 %v1387_v48, %v1387_v48  ;;  %v456_v62 = vmul.f32 %v1395_v52, %v1395_v52  ;;  %v468_v0 = vmul.f32 %v1405_v58, %v1405_v58 }
  0xc2   : > { %v437_v53 = vsel %vm389_vm0, %v433_v49, 0.0  ;;  %v449_v59 = vsel %vm389_vm0, %v445_v55, 0.0  ;;  %v461_v1 = vsel %vm389_vm0, %v457_v61, 0.0  ;;  %v1419_v3 = vsub.f32 %v1054_v21, %v429_v43 }
  0xc3   : > { %v434_v54 = vsel %vm389_vm0, %v432_v50, 0.0  ;;  %438 = vadd.xlane.f32.xlu1 %v437_v53  ;;  %v446_v60 = vsel %vm389_vm0, %v444_v56, 0.0  ;;  %v458_v2 = vsel %vm389_vm0, %v456_v62, 0.0  ;;  %v1421_v4 = vsub.f32 %v1053_v22, %v428_v44  ;;  %v1174_v50 = vld [vmem:[%s1574_s5 + $0x30] sm:$0xff]   ;;  %v1175_v53 = vld [vmem:[%s1574_s5 + $0x48] sm:$0xff]   ;;  %v1180_v62 = vld [vmem:[%s1574_s5 + $0x60] sm:$0xff]  }
  0xc4   : > { %435 = vadd.xlane.f32.xlu0 %v434_v54  ;;  %v473_v5 = vsel %vm389_vm0, %v469_v63, 0.0  ;;  %v470_v6 = vsel %vm389_vm0, %v468_v0, 0.0  ;;  %v481_v7 = vmul.f32 %v1419_v3, %v1419_v3  ;;  %v1251_v13 = vmov 0.0  }
  0xc5   : > { %v480_v8 = vmul.f32 %v1421_v4, %v1421_v4  ;;  %1075 = vmatprep.subr.bf16.mxu0 %v1251_v13  ;;  %1085 = vmatprep.subr.bf16.mxu1 %v1251_v13 }
  0xc6   : > { %v485_v9 = vsel %vm389_vm0, %v481_v7, 0.0  ;;  %1076 = vmatpush3.bf16.msra.mxu0 %v1168_v11  ;;  %1086 = vmatpush3.bf16.msra.mxu1 %v1169_v12 }
  0xc7   : > { %450 = vadd.xlane.f32.xlu1 %v449_v59  ;;  %v482_v10 = vsel %vm389_vm0, %v480_v8, 0.0  ;;  %1077 = vmatprep.subr.bf16.mxu0 %v1251_v13 }
  0xc8   : > { %447 = vadd.xlane.f32.xlu0 %v446_v60  ;;  %1087 = vmatprep.subr.bf16.mxu1 %v1251_v13 }
  0xc9   : > { %1081 = vmatprep.mubr.msk.bf16.mxu0 %vm1252_vm1, %v1251_v13  ;;  %1091 = vmatprep.mubr.msk.bf16.mxu1 %vm1252_vm1, %v1251_v13 }
  0xca   : > { %1078 = vmatpush3.bf16.msra.mxu0 %v1170_v14  ;;  %1088 = vmatpush3.bf16.msra.mxu1 %v1171_v15 }
  0xcb   : > { %462 = vadd.xlane.f32.xlu1 %v461_v1  ;;  %1079 = vmatprep.subr.bf16.mxu0 %v1251_v13 }
  0xcc   : > { %459 = vadd.xlane.f32.xlu0 %v458_v2  ;;  %1089 = vmatprep.subr.bf16.mxu1 %v1251_v13 }
  0xce   : > { %1080 = vmatpush3.bf16.msra.mxu0 %v1172_v16  ;;  %1090 = vmatpush3.bf16.msra.mxu1 %v1173_v17 }
  0xcf   : > { %474 = vadd.xlane.f32.xlu1 %v473_v5  ;;  %1095 = vmatprep.subr.bf16.mxu0 %v1251_v13 }
  0xd0   : > { %471 = vadd.xlane.f32.xlu0 %v470_v6  ;;  %1105 = vmatprep.subr.bf16.mxu1 %v1251_v13 }
  0xd3   : > { %486 = vadd.xlane.f32.xlu1 %v485_v9 }
  0xd4   : > { %483 = vadd.xlane.f32.xlu0 %v482_v10 }
 0x150   : > { %v439_v18 = vpop.xlane.xlu1 %438 }
 0x151   : > { %v436_v19 = vpop.xlane.xlu0 %435 }
 0x154   : > { %v451_v20 = vpop.xlane.xlu1 %450 }
 0x155   : > { %v448_v21 = vpop.xlane.xlu0 %447  ;;  %v453_v24 = vadd.f32 %v451_v20, %v439_v18 }
 0x156   : > { %v452_v25 = vadd.f32 %v448_v21, %v436_v19 }
 0x158   : > { %v463_v22 = vpop.xlane.xlu1 %462 }
 0x159   : > { %v460_v23 = vpop.xlane.xlu0 %459  ;;  %v465_v28 = vadd.f32 %v463_v22, %v453_v24 }
 0x15a   : > { %v464_v29 = vadd.f32 %v460_v23, %v452_v25  ;;  %v1028_v25 = vld [vmem:[%s1575_s6] ss:$0 sm:$0xff] }
 0x15c   : > { %v475_v26 = vpop.xlane.xlu1 %474 }
 0x15d   : > { %v472_v27 = vpop.xlane.xlu0 %471  ;;  %v477_v30 = vadd.f32 %v475_v26, %v465_v28 }
 0x15e   : > { %v476_v31 = vadd.f32 %v472_v27, %v464_v29 }
 0x160   : > { %v487_v32 = vpop.xlane.xlu1 %486 }
 0x161   : > { %v484_v33 = vpop.xlane.xlu0 %483  ;;  %v489_v34 = vadd.f32 %v487_v32, %v477_v30 }
 0x162   : > { %v488_v35 = vadd.f32 %v484_v33, %v476_v31 }
 0x163   : > { %v491_v36 = vmul.f32 0.004166667, %v489_v34 }
 0x164   : > { %v490_v37 = vmul.f32 0.004166667, %v488_v35 }
 0x165   : > { %v493_v38 = vadd.f32 1e-05, %v491_v36 }
 0x166   : > { %v492_v39 = vadd.f32 1e-05, %v490_v37 }
 0x167   : > { %1183 = vrsqrt.f32 %v493_v38 }
 0x168   : > { %1185 = vrsqrt.f32 %v492_v39 }
 0x171   : > { %v1184_v40 = vpop.eup %1183 }
 0x172   : > { %v1186_v41 = vpop.eup %1185  ;;  %v506_v42 = vmul.f32 %v1184_v40, %v1385_v47  ;;  %v497_v43 = vmul.f32 %v1184_v40, %v1381_v45  ;;  %v1176_v45 = vld [vmem:[%s1574_s5 + $0x38] sm:$0xff]   ;;  %v1178_v47 = vld [vmem:[%s1574_s5 + $0x40] sm:$0xff]   ;;  %v639_v56 = vmul.f32 %v1184_v40, %v1393_v51  ;;  %v712_v61 = vmul.f32 %v1184_v40, %v1403_v57  ;;  %v1181_v51 = vld [vmem:[%s1574_s5 + $0x68] sm:$0xff]  }
 0x173   : > { %v505_v44 = vmul.f32 %v1186_v41, %v1387_v48  ;;  %v496_v49 = vmul.f32 %v1186_v41, %v1383_v46  ;;  %v1177_v46 = vld [vmem:[%s1574_s5 + $0x50] sm:$0xff]   ;;  %v1179_v48 = vld [vmem:[%s1574_s5 + $0x58] sm:$0xff]   ;;  %v638_v59 = vmul.f32 %v1186_v41, %v1395_v52  ;;  %v711_v60 = vmul.f32 %v1186_v41, %v1405_v58 }
 0x174   : > { %v1182_v52 = vld [vmem:[%s1574_s5 + $0x70] sm:$0xff]   ;;  %v784_v57 = vmul.f32 %v1186_v41, %v1421_v4  ;;  %v785_v58 = vmul.f32 %v1184_v40, %v1419_v3 }
 0x175   : > { %v507_v54 = vpack.c.bf16 %v506_v42, %v505_v44  ;;  %v498_v55 = vpack.c.bf16 %v497_v43, %v496_v49  ;;  %v640_v63 = vpack.c.bf16 %v639_v56, %v638_v59  ;;  %v713_v0 = vpack.c.bf16 %v712_v61, %v711_v60 }
 0x176   : > { %v786_v1 = vpack.c.bf16 %v785_v58, %v784_v57 }
 0x177   : > { %1082 = vmatmul.mubr.msk.bf16.vlgmr.msra.gmra.mrb[0].mxu0 %vm389_vm0, %v507_v54  ;;  %1092 = vmatmul.mubr.msk.bf16.vlgmr.msra.gmra.mrb[0].mxu1 %vm389_vm0, %v498_v55 }
 0x178   : > { %1096 = vmatpush3.bf16.msra.mxu0 %v1174_v50  ;;  %1106 = vmatpush3.bf16.msra.mxu1 %v1175_v53 }
 0x179   : > { %1097 = vmatprep.subr.bf16.mxu0 %v1251_v13  ;;  %1107 = vmatprep.subr.bf16.mxu1 %v1251_v13 }
 0x17a   : > { %1101 = vmatprep.mubr.msk.bf16.mxu0 %vm1252_vm1, %v1251_v13  ;;  %1111 = vmatprep.mubr.msk.bf16.mxu1 %vm1252_vm1, %v1251_v13 }
 0x17c   : > { %1098 = vmatpush3.bf16.msra.mxu0 %v1176_v45  ;;  %1108 = vmatpush3.bf16.msra.mxu1 %v1177_v46 }
 0x17d   : > { %1099 = vmatprep.subr.bf16.mxu0 %v1251_v13  ;;  %1109 = vmatprep.subr.bf16.mxu1 %v1251_v13 }
 0x180   : > { %1100 = vmatpush3.bf16.msra.mxu0 %v1178_v47  ;;  %1110 = vmatpush3.bf16.msra.mxu1 %v1179_v48 }
 0x181   : > { %1115 = vmatprep.subr.bf16.mxu0 %v1251_v13 }
 0x183   : > { %1102 = vmatmul.mubr.msk.bf16.vlgmr.msra.gmra.mrb[4].mxu0 %vm389_vm0, %v640_v63  ;;  %1112 = vmatmul.mubr.msk.bf16.vlgmr.msra.gmra.mrb[4].mxu1 %vm389_vm0, %v713_v0 }
 0x184   : > { %1116 = vmatpush3.bf16.msra.mxu0 %v1180_v62  ;;  %1121 = vmatprep.mubr.msk.bf16.mxu0 %vm1252_vm1, %v1251_v13 }
 0x185   : > { %1117 = vmatprep.subr.bf16.mxu0 %v1251_v13 }
 0x188   : > { %1118 = vmatpush3.bf16.msra.mxu0 %v1181_v51 }
 0x189   : > { %1119 = vmatprep.subr.bf16.mxu0 %v1251_v13 }
 0x18c   : > { %1120 = vmatpush3.bf16.msra.mxu0 %v1182_v52 }
 0x18f   : > { %1122 = vmatmul.mubr.msk.bf16.vlgmr.msra.gmra.mrb[8].mxu0 %vm389_vm0, %v786_v1 }
 0x24a   : > { %v569_v2 = vpop.f32.mrb[0].mxu0  ;;  %v631_v5 = vpop.f32.mrb[0].mxu1 }
 0x24b   : > { %v632_v6 = vadd.f32 %v631_v5, %v569_v2  ;;  %v1083_v7 = vpop.f32.mrb[1].mxu0  ;;  %v1093_v8 = vpop.f32.mrb[1].mxu1 }
 0x24c   : > { %v572_v9 = vpop.f32.mrb[2].mxu0  ;;  %v634_v10 = vpop.f32.mrb[2].mxu1 }
 0x24d   : > { %v635_v11 = vadd.f32 %v634_v10, %v572_v9  ;;  %v1084_v12 = vpop.f32.mrb[3].mxu0  ;;  %v1094_v14 = vpop.f32.mrb[3].mxu1 }
 0x256   : > { %v702_v13 = vpop.f32.mrb[4].mxu0  ;;  %v775_v15 = vpop.f32.mrb[4].mxu1 }
 0x257   : > { %v709_v4 = vadd.f32 %v702_v13, %v632_v6  ;;  %v1103_v16 = vpop.f32.mrb[5].mxu0  ;;  %v1113_v3 = vpop.f32.mrb[5].mxu1 }
 0x258   : > { %v705_v17 = vpop.f32.mrb[6].mxu0  ;;  %v778_v18 = vpop.f32.mrb[6].mxu1 }
 0x259   : > { %v782_v19 = vadd.f32 %v775_v15, %v709_v4  ;;  %v710_v20 = vadd.f32 %v705_v17, %v635_v11  ;;  %v1104_v21 = vpop.f32.mrb[7].mxu0  ;;  %v1114_v22 = vpop.f32.mrb[7].mxu1 }
 0x25b   : > { %v783_v23 = vadd.f32 %v778_v18, %v710_v20 }
 0x262   : > { %v848_v24 = vpop.f32.mrb[8].mxu0 }
 0x263   : > { %v855_v26 = vadd.f32 %v848_v24, %v782_v19  ;;  %v1123_v27 = vpop.f32.mrb[9].mxu0 }
 0x264   : > { %v851_v28 = vpop.f32.mrb[10].mxu0 }
 0x265   : > { %v864_v29 = vadd.f32 %v1028_v25, %v855_v26  ;;  %v856_v30 = vadd.f32 %v851_v28, %v783_v23  ;;  %v1124_v31 = vpop.f32.mrb[11].mxu0 }
 0x267   : > { %867 = vst.msk [vmem:[%s336_s22] sm:$0xff] %vm866_vm2, %v864_v29  ;;  %v865_v32 = vadd.f32 %v1028_v25, %v856_v30 }
 0x269   : > { %868 = vst.msk [vmem:[%s336_s22 + $0x8] sm:$0xff] %vm866_vm2, %v865_v32 }
 0x26a   : > { %1200 = shalt.err (!%p1197_p3)
}
 0x26b   : > { %s1201_s18 = scalar_lea.hbm %s1524_s13, 256  ;;  %s1205_s21 = scalar_lea.hbm %s1576_s7, 512 }
 0x26c   : > { %p1202_p4 = scmp.ne.s32.totalorder %s1524_s13, %s1201_s18  ;;  %p1206_p9 = scmp.lt.u32.totalorder %s1524_s13, %s1576_s7 }
 0x26d   : > { %p1207_p10 = scmp.lt.u32.totalorder %s1205_s21, %s1201_s18  ;;  %p1209_p12 = scmp.lt.u32.totalorder %s1201_s18, %s1524_s13 }
 0x26e   : > { %p1203_p7 = pnand %p1202_p4, %p1334_p5 }
 0x26f   : > { %p1208_p11 = por %p1207_p10, %p1206_p9 }
 0x270   : > { %p1204_p8 = pneg %p1203_p7 }
 0x271   : > { %p1210_p13 = por %p1209_p12, %p1208_p11 }
 0x273   : > { %p1211_p0 = pnand %p1210_p13, %p1204_p8 }
 0x275   : > { %1214 = shalt.err (!%p1211_p0)
}
 0x276   : > { %s1254_s8 = smov 128   ;;  %s1255_s9 = smov 8  }
 0x277   : > { %1125 = dma.vmem_to_hbm [thread:$0]  (%p1334_p5), %s1526_s23, 256, %s1524_s13, %s1528_s15, %s1254_s8, %s1254_s8, %s1255_s9  }
 0x278 PF: > { %p1131_p1 = scmp.ge.s32.totalorder %s1249_s27, 2  ;;  %s898_s28 = sand.u32 1, %s1237_s24  }
 0x279   : > { %s899_s16 = scalar_lea.sflag [#allocation3], %s898_s28 }
 0x27a   : > { %p1128_p2 = pnand %p1131_p1, %p1338_p6 }
 0x27c   : > { %1232 = dma.done.wait (!%p1128_p2), %s899_s16, 256  }
 0x27d   : > { %1234 = vsyncadd (!%p1128_p2), %s899_s16, 4294967040  ;;  %p17_p3 = scmp.ge.s32.totalorder %s1321_s30, 4   ;;  %s1579_s24 = smov %s1241_s25 }
 0x27e   : > { %s1580_s25 = smov %s1245_s26  ;;  %s1581_s26 = smov %s1332_s10 }
 0x27f   : > { %s1582_s27 = smov %s1321_s30  ;;  %19 = sbr.rel (!%p17_p3) target bundleno = 3 (0x3), region = 95 }
 0x286   :  { %904 = vsyncpa [#allocation3], 1 }
 0x287   :  { %906 = vsyncpa [#allocation3 + $0x1], 1 }

</bundles_post_ra>
